<compile_context>
chip_gen: v7x
topology: tpu7x:2x2x1
jax: 0.10.0
libtpu: 0.0.40
codegen_flags: <defaults>
</compile_context>

<pallas_src>
import functools

import jax
import jax.numpy as jnp
from jax.experimental import pallas as pl
from jax.experimental.pallas import tpu as pltpu


# ----------------------------------------------------------------------------
# Pallas kernel: both LSTM layers + output Linear for the whole sequence.
# ----------------------------------------------------------------------------
def decoder_kernel(x_ref,                        # (1, D)   latent row (same every timestep)
                   wih1_ref, whh1_ref, b1_ref,   # (D,4H1), (H1,4H1), (1,4H1)
                   w2_ref, b2_ref,               # (H1+H2, 4H2), (1,4H2)   [Wih2; Whh2] stacked
                   wout_ref, bout_ref,           # (H2, F), (1, F)
                   out_ref,                      # (S, F)
                   hs_ref):                      # (S, H2) VMEM scratch for per-step h2
    S = hs_ref.shape[0]
    H1 = whh1_ref.shape[0]
    H2 = hs_ref.shape[1]

    whh1 = whh1_ref[...]
    w2 = w2_ref[...]
    b2 = b2_ref[...]

    # opt 1: loop-invariant layer-1 input contribution, computed once.
    xg1 = (jnp.dot(x_ref[...], wih1_ref[...], preferred_element_type=jnp.float32)
           + b1_ref[...])                                                  # (1, 4H1)

    def gate_math(gates, c, H):
        # PyTorch gate order: i, f, g, o.  Full-width EUP passes, then lane slices.
        sg = jax.nn.sigmoid(gates)
        th = jnp.tanh(gates)
        i = sg[:, 0 * H:1 * H]
        f = sg[:, 1 * H:2 * H]
        g = th[:, 2 * H:3 * H]
        o = sg[:, 3 * H:4 * H]
        c_new = f * c + i * g
        h_new = o * jnp.tanh(c_new)
        return h_new, c_new

    h1 = jnp.zeros((1, H1), jnp.float32)
    c1 = jnp.zeros((1, H1), jnp.float32)
    h2 = jnp.zeros((1, H2), jnp.float32)
    c2 = jnp.zeros((1, H2), jnp.float32)

    # opt 4: S is a static Python int -> fully unrolled recurrence.
    for t in range(S):
        # layer 1: only the recurrent matmul sits on the serial critical path.
        gates1 = xg1 + jnp.dot(h1, whh1, preferred_element_type=jnp.float32)
        h1, c1 = gate_math(gates1, c1, H1)

        # layer 2 (opt 2): single fused [h1, h2] @ [Wih2; Whh2] matmul.
        z = jnp.concatenate([h1, h2], axis=1)                              # (1, H1+H2)
        gates2 = jnp.dot(z, w2, preferred_element_type=jnp.float32) + b2   # (1, 4H2)
        h2, c2 = gate_math(gates2, c2, H2)

        hs_ref[pl.ds(t, 1), :] = h2

    # opt 3: one batched output projection + a single contiguous store.
    out = (jnp.dot(hs_ref[...], wout_ref[...], preferred_element_type=jnp.float32)
           + bout_ref[...])                                                # (S, F)
    out_ref[...] = out.astype(out_ref.dtype)


# ----------------------------------------------------------------------------
# Wrapper: parameter plumbing (transpose / bias fusion / weight stacking) + pallas_call.
# ----------------------------------------------------------------------------
def decoder_forward(x, params, *, seq_len, input_dim, n_features):
    # TODO(synk): kernel supports only n_features == 1 (single-batch recurrence);
    # for n_features > 1 add a leading "parallel" grid axis over the batch.
    assert n_features == 1, "kernel currently supports n_features == 1"
    hidden_dim = 2 * input_dim

    # latent code from the encoder: (n_features, input_dim) -> (1, D).
    # The original `x.repeat(seq_len, n_features).reshape(...)` just replicates this
    # row seq_len times; the replication is folded into the kernel (loop-invariant
    # input contribution), so no (S, D) array is materialized.
    x2d = x.reshape(1, input_dim).astype(jnp.float32)

    wih1 = params["rnn1"]["w_ih"].T                                   # (D, 4*H1)
    whh1 = params["rnn1"]["w_hh"].T                                   # (H1, 4*H1)
    b1 = (params["rnn1"]["b_ih"] + params["rnn1"]["b_hh"])[None, :]   # (1, 4*H1)
    # stacked layer-2 weights: [Wih2; Whh2]  -> (H1 + H2, 4*H2)
    w2 = jnp.concatenate([params["rnn2"]["w_ih"].T,
                          params["rnn2"]["w_hh"].T], axis=0)
    b2 = (params["rnn2"]["b_ih"] + params["rnn2"]["b_hh"])[None, :]   # (1, 4*H2)
    wout = params["out"]["w"].T                                       # (H2, F)
    bout = params["out"]["b"][None, :]                                # (1, F)

    vmem = pl.BlockSpec(memory_space=pltpu.MemorySpace.VMEM)
    out = pl.pallas_call(
        decoder_kernel,
        out_shape=jax.ShapeDtypeStruct((seq_len, n_features), jnp.float32),
        in_specs=[vmem] * 8,
        out_specs=vmem,
        scratch_shapes=[pltpu.VMEM((seq_len, hidden_dim), jnp.float32)],
    )(x2d, wih1, whh1, b1, w2, b2, wout, bout)
    return out


# ----------------------------------------------------------------------------
# Pure-JAX reference (for correctness check).
# ----------------------------------------------------------------------------
def decoder_reference(x, params, *, seq_len, input_dim, n_features):
    hidden_dim = 2 * input_dim
    xr = jnp.tile(x, (seq_len, n_features)).reshape(n_features, seq_len, input_dim)
    seq = xr[0]

    def run_lstm(seq, p, H):
        wih, whh = p["w_ih"], p["w_hh"]
        b = p["b_ih"] + p["b_hh"]

        def cell(carry, x_t):
            h, c = carry
            gates = x_t @ wih.T + h @ whh.T + b
            i, f, g, o = jnp.split(gates, 4)
            i, f, o = jax.nn.sigmoid(i), jax.nn.sigmoid(f), jax.nn.sigmoid(o)
            g = jnp.tanh(g)
            c = f * c + i * g
            h = o * jnp.tanh(c)
            return (h, c), h

        init = (jnp.zeros((H,), jnp.float32), jnp.zeros((H,), jnp.float32))
        _, hs = jax.lax.scan(cell, init, seq)
        return hs

    h1 = run_lstm(seq, params["rnn1"], input_dim)
    h2 = run_lstm(h1, params["rnn2"], hidden_dim)
    return h2 @ params["out"]["w"].T + params["out"]["b"]


# ----------------------------------------------------------------------------
# Deterministic parameter init (PyTorch-style shapes, uniform(-1/sqrt(H), 1/sqrt(H))).
# ----------------------------------------------------------------------------
def init_params(key, seq_len, input_dim, n_features):
    hidden_dim = 2 * input_dim
    keys = jax.random.split(key, 10)

    def unif(k, shape, bound):
        return jax.random.uniform(k, shape, jnp.float32, -bound, bound)

    b1 = 1.0 / jnp.sqrt(input_dim)
    b2 = 1.0 / jnp.sqrt(hidden_dim)
    params = {
        "rnn1": {
            "w_ih": unif(keys[0], (4 * input_dim, input_dim), b1),
            "w_hh": unif(keys[1], (4 * input_dim, input_dim), b1),
            "b_ih": unif(keys[2], (4 * input_dim,), b1),
            "b_hh": unif(keys[3], (4 * input_dim,), b1),
        },
        "rnn2": {
            "w_ih": unif(keys[4], (4 * hidden_dim, input_dim), b2),
            "w_hh": unif(keys[5], (4 * hidden_dim, hidden_dim), b2),
            "b_ih": unif(keys[6], (4 * hidden_dim,), b2),
            "b_hh": unif(keys[7], (4 * hidden_dim,), b2),
        },
        "out": {
            "w": unif(keys[8], (n_features, hidden_dim), b2),
            "b": unif(keys[9], (n_features,), b2),
        },
    }
    return params


if __name__ == "__main__":
    seq_len, input_dim, n_features = 8, 32, 1

    key = jax.random.PRNGKey(0)
    k_x, k_p = jax.random.split(key)
    # latent code from the encoder: (n_features, input_dim)
    x = jax.random.normal(k_x, (n_features, input_dim), jnp.float32)
    params = init_params(k_p, seq_len, input_dim, n_features)

    fwd = jax.jit(functools.partial(decoder_forward, seq_len=seq_len,
                                    input_dim=input_dim, n_features=n_features))
    out = fwd(x, params)
    out = jax.block_until_ready(out)

    ref = decoder_reference(x, params, seq_len=seq_len,
                            input_dim=input_dim, n_features=n_features)
    assert out.shape == (seq_len, n_features)
    assert jnp.allclose(out, ref, atol=1e-4, rtol=1e-4), (out, ref)

    print("KERNEL_OK")
</pallas_src>

<mosaic_0001>
module attributes {stable_mosaic.version = 11 : i64} {
  func.func @decoder_kernel(%arg0: memref<1x32xf32, #tpu.memory_space<vmem>>, %arg1: memref<32x128xf32, #tpu.memory_space<vmem>>, %arg2: memref<32x128xf32, #tpu.memory_space<vmem>>, %arg3: memref<1x128xf32, #tpu.memory_space<vmem>>, %arg4: memref<96x256xf32, #tpu.memory_space<vmem>>, %arg5: memref<1x256xf32, #tpu.memory_space<vmem>>, %arg6: memref<64x1xf32, #tpu.memory_space<vmem>>, %arg7: memref<1x1xf32, #tpu.memory_space<vmem>>, %arg8: memref<8x1xf32, #tpu.memory_space<vmem>>, %arg9: memref<8x64xf32, #tpu.memory_space<vmem>>) attributes {dimension_semantics = [], scalar_prefetch = 0 : i64, scratch_operands = 1 : i64, tpu.core_type = #tpu.core_type<tc>} {
    %c0 = arith.constant 0 : index
    %c0_0 = arith.constant 0 : index
    %0 = vector.load %arg2[%c0, %c0_0] : memref<32x128xf32, #tpu.memory_space<vmem>>, vector<32x128xf32>
    %c0_1 = arith.constant 0 : index
    %c0_2 = arith.constant 0 : index
    %1 = vector.load %arg4[%c0_1, %c0_2] : memref<96x256xf32, #tpu.memory_space<vmem>>, vector<96x256xf32>
    %c0_3 = arith.constant 0 : index
    %c0_4 = arith.constant 0 : index
    %2 = vector.load %arg5[%c0_3, %c0_4] : memref<1x256xf32, #tpu.memory_space<vmem>>, vector<1x256xf32>
    %c0_5 = arith.constant 0 : index
    %c0_6 = arith.constant 0 : index
    %3 = vector.load %arg0[%c0_5, %c0_6] : memref<1x32xf32, #tpu.memory_space<vmem>>, vector<1x32xf32>
    %c0_7 = arith.constant 0 : index
    %c0_8 = arith.constant 0 : index
    %4 = vector.load %arg1[%c0_7, %c0_8] : memref<32x128xf32, #tpu.memory_space<vmem>>, vector<32x128xf32>
    %cst = arith.constant dense<0.000000e+00> : vector<1x128xf32>
    %5 = tpu.matmul %3, %4, %cst {dimension_numbers = #tpu.dot_dimension_numbers<[1], [0], [0], [1], [0, 0, 1, 1], [], []>} : vector<1x32xf32>, vector<32x128xf32>, vector<1x128xf32> -> vector<1x128xf32>
    %c0_9 = arith.constant 0 : index
    %c0_10 = arith.constant 0 : index
    %6 = vector.load %arg3[%c0_9, %c0_10] : memref<1x128xf32, #tpu.memory_space<vmem>>, vector<1x128xf32>
    %7 = arith.addf %5, %6 : vector<1x128xf32>
    %cst_11 = arith.constant 0.000000e+00 : f32
    %8 = vector.broadcast %cst_11 : f32 to vector<1x32xf32>
    %cst_12 = arith.constant 0.000000e+00 : f32
    %9 = vector.broadcast %cst_12 : f32 to vector<1x32xf32>
    %cst_13 = arith.constant 0.000000e+00 : f32
    %10 = vector.broadcast %cst_13 : f32 to vector<1x64xf32>
    %cst_14 = arith.constant 0.000000e+00 : f32
    %11 = vector.broadcast %cst_14 : f32 to vector<1x64xf32>
    %cst_15 = arith.constant dense<0.000000e+00> : vector<1x128xf32>
    %12 = tpu.matmul %8, %0, %cst_15 {dimension_numbers = #tpu.dot_dimension_numbers<[1], [0], [0], [1], [0, 0, 1, 1], [], []>} : vector<1x32xf32>, vector<32x128xf32>, vector<1x128xf32> -> vector<1x128xf32>
    %13 = arith.addf %7, %12 : vector<1x128xf32>
    %14 = arith.negf %13 : vector<1x128xf32>
    %15 = math.exp %14 : vector<1x128xf32>
    %cst_16 = arith.constant 1.000000e+00 : f32
    %16 = vector.broadcast %cst_16 : f32 to vector<1x128xf32>
    %17 = arith.addf %16, %15 : vector<1x128xf32>
    %18 = arith.divf %16, %17 : vector<1x128xf32>
    %19 = math.tanh %13 : vector<1x128xf32>
    %20 = vector.extract_strided_slice %18 {offsets = [0, 0], sizes = [1, 32], strides = [1, 1]} : vector<1x128xf32> to vector<1x32xf32>
    %21 = vector.extract_strided_slice %18 {offsets = [0, 32], sizes = [1, 32], strides = [1, 1]} : vector<1x128xf32> to vector<1x32xf32>
    %22 = vector.extract_strided_slice %19 {offsets = [0, 64], sizes = [1, 32], strides = [1, 1]} : vector<1x128xf32> to vector<1x32xf32>
    %23 = vector.extract_strided_slice %18 {offsets = [0, 96], sizes = [1, 32], strides = [1, 1]} : vector<1x128xf32> to vector<1x32xf32>
    %24 = arith.mulf %21, %9 : vector<1x32xf32>
    %25 = arith.mulf %20, %22 : vector<1x32xf32>
    %26 = arith.addf %24, %25 : vector<1x32xf32>
    %27 = math.tanh %26 : vector<1x32xf32>
    %28 = arith.mulf %23, %27 : vector<1x32xf32>
    %29 = tpu.concatenate %28, %10 in 1 : vector<1x32xf32>, vector<1x64xf32> -> vector<1x96xf32>
    %cst_17 = arith.constant dense<0.000000e+00> : vector<1x256xf32>
    %30 = tpu.matmul %29, %1, %cst_17 {dimension_numbers = #tpu.dot_dimension_numbers<[1], [0], [0], [1], [0, 0, 1, 1], [], []>} : vector<1x96xf32>, vector<96x256xf32>, vector<1x256xf32> -> vector<1x256xf32>
    %31 = arith.addf %30, %2 : vector<1x256xf32>
    %32 = arith.negf %31 : vector<1x256xf32>
    %33 = math.exp %32 : vector<1x256xf32>
    %cst_18 = arith.constant 1.000000e+00 : f32
    %34 = vector.broadcast %cst_18 : f32 to vector<1x256xf32>
    %35 = arith.addf %34, %33 : vector<1x256xf32>
    %36 = arith.divf %34, %35 : vector<1x256xf32>
    %37 = math.tanh %31 : vector<1x256xf32>
    %38 = vector.extract_strided_slice %36 {offsets = [0, 0], sizes = [1, 64], strides = [1, 1]} : vector<1x256xf32> to vector<1x64xf32>
    %39 = vector.extract_strided_slice %36 {offsets = [0, 64], sizes = [1, 64], strides = [1, 1]} : vector<1x256xf32> to vector<1x64xf32>
    %40 = vector.extract_strided_slice %37 {offsets = [0, 128], sizes = [1, 64], strides = [1, 1]} : vector<1x256xf32> to vector<1x64xf32>
    %41 = vector.extract_strided_slice %36 {offsets = [0, 192], sizes = [1, 64], strides = [1, 1]} : vector<1x256xf32> to vector<1x64xf32>
    %42 = arith.mulf %39, %11 : vector<1x64xf32>
    %43 = arith.mulf %38, %40 : vector<1x64xf32>
    %44 = arith.addf %42, %43 : vector<1x64xf32>
    %45 = math.tanh %44 : vector<1x64xf32>
    %46 = arith.mulf %41, %45 : vector<1x64xf32>
    %c0_19 = arith.constant 0 : index
    %c0_20 = arith.constant 0 : index
    %47 = vector.load %arg9[%c0_19, %c0_20] : memref<8x64xf32, #tpu.memory_space<vmem>>, vector<1x64xf32>
    tpu.vector_store %arg9[%c0_19, %c0_20], %46 {strides = array<i32>} : memref<8x64xf32, #tpu.memory_space<vmem>>, vector<1x64xf32>,
    %cst_21 = arith.constant dense<0.000000e+00> : vector<1x128xf32>
    %48 = tpu.matmul %28, %0, %cst_21 {dimension_numbers = #tpu.dot_dimension_numbers<[1], [0], [0], [1], [0, 0, 1, 1], [], []>} : vector<1x32xf32>, vector<32x128xf32>, vector<1x128xf32> -> vector<1x128xf32>
    %49 = arith.addf %7, %48 : vector<1x128xf32>
    %50 = arith.negf %49 : vector<1x128xf32>
    %51 = math.exp %50 : vector<1x128xf32>
    %cst_22 = arith.constant 1.000000e+00 : f32
    %52 = vector.broadcast %cst_22 : f32 to vector<1x128xf32>
    %53 = arith.addf %52, %51 : vector<1x128xf32>
    %54 = arith.divf %52, %53 : vector<1x128xf32>
    %55 = math.tanh %49 : vector<1x128xf32>
    %56 = vector.extract_strided_slice %54 {offsets = [0, 0], sizes = [1, 32], strides = [1, 1]} : vector<1x128xf32> to vector<1x32xf32>
    %57 = vector.extract_strided_slice %54 {offsets = [0, 32], sizes = [1, 32], strides = [1, 1]} : vector<1x128xf32> to vector<1x32xf32>
    %58 = vector.extract_strided_slice %55 {offsets = [0, 64], sizes = [1, 32], strides = [1, 1]} : vector<1x128xf32> to vector<1x32xf32>
    %59 = vector.extract_strided_slice %54 {offsets = [0, 96], sizes = [1, 32], strides = [1, 1]} : vector<1x128xf32> to vector<1x32xf32>
    %60 = arith.mulf %57, %26 : vector<1x32xf32>
    %61 = arith.mulf %56, %58 : vector<1x32xf32>
    %62 = arith.addf %60, %61 : vector<1x32xf32>
    %63 = math.tanh %62 : vector<1x32xf32>
    %64 = arith.mulf %59, %63 : vector<1x32xf32>
    %65 = tpu.concatenate %64, %46 in 1 : vector<1x32xf32>, vector<1x64xf32> -> vector<1x96xf32>
    %cst_23 = arith.constant dense<0.000000e+00> : vector<1x256xf32>
    %66 = tpu.matmul %65, %1, %cst_23 {dimension_numbers = #tpu.dot_dimension_numbers<[1], [0], [0], [1], [0, 0, 1, 1], [], []>} : vector<1x96xf32>, vector<96x256xf32>, vector<1x256xf32> -> vector<1x256xf32>
    %67 = arith.addf %66, %2 : vector<1x256xf32>
    %68 = arith.negf %67 : vector<1x256xf32>
    %69 = math.exp %68 : vector<1x256xf32>
    %cst_24 = arith.constant 1.000000e+00 : f32
    %70 = vector.broadcast %cst_24 : f32 to vector<1x256xf32>
    %71 = arith.addf %70, %69 : vector<1x256xf32>
    %72 = arith.divf %70, %71 : vector<1x256xf32>
    %73 = math.tanh %67 : vector<1x256xf32>
    %74 = vector.extract_strided_slice %72 {offsets = [0, 0], sizes = [1, 64], strides = [1, 1]} : vector<1x256xf32> to vector<1x64xf32>
    %75 = vector.extract_strided_slice %72 {offsets = [0, 64], sizes = [1, 64], strides = [1, 1]} : vector<1x256xf32> to vector<1x64xf32>
    %76 = vector.extract_strided_slice %73 {offsets = [0, 128], sizes = [1, 64], strides = [1, 1]} : vector<1x256xf32> to vector<1x64xf32>
    %77 = vector.extract_strided_slice %72 {offsets = [0, 192], sizes = [1, 64], strides = [1, 1]} : vector<1x256xf32> to vector<1x64xf32>
    %78 = arith.mulf %75, %44 : vector<1x64xf32>
    %79 = arith.mulf %74, %76 : vector<1x64xf32>
    %80 = arith.addf %78, %79 : vector<1x64xf32>
    %81 = math.tanh %80 : vector<1x64xf32>
    %82 = arith.mulf %77, %81 : vector<1x64xf32>
    %c1 = arith.constant 1 : index
    %c0_25 = arith.constant 0 : index
    %83 = vector.load %arg9[%c1, %c0_25] : memref<8x64xf32, #tpu.memory_space<vmem>>, vector<1x64xf32>
    tpu.vector_store %arg9[%c1, %c0_25], %82 {strides = array<i32>} : memref<8x64xf32, #tpu.memory_space<vmem>>, vector<1x64xf32>,
    %cst_26 = arith.constant dense<0.000000e+00> : vector<1x128xf32>
    %84 = tpu.matmul %64, %0, %cst_26 {dimension_numbers = #tpu.dot_dimension_numbers<[1], [0], [0], [1], [0, 0, 1, 1], [], []>} : vector<1x32xf32>, vector<32x128xf32>, vector<1x128xf32> -> vector<1x128xf32>
    %85 = arith.addf %7, %84 : vector<1x128xf32>
    %86 = arith.negf %85 : vector<1x128xf32>
    %87 = math.exp %86 : vector<1x128xf32>
    %cst_27 = arith.constant 1.000000e+00 : f32
    %88 = vector.broadcast %cst_27 : f32 to vector<1x128xf32>
    %89 = arith.addf %88, %87 : vector<1x128xf32>
    %90 = arith.divf %88, %89 : vector<1x128xf32>
    %91 = math.tanh %85 : vector<1x128xf32>
    %92 = vector.extract_strided_slice %90 {offsets = [0, 0], sizes = [1, 32], strides = [1, 1]} : vector<1x128xf32> to vector<1x32xf32>
    %93 = vector.extract_strided_slice %90 {offsets = [0, 32], sizes = [1, 32], strides = [1, 1]} : vector<1x128xf32> to vector<1x32xf32>
    %94 = vector.extract_strided_slice %91 {offsets = [0, 64], sizes = [1, 32], strides = [1, 1]} : vector<1x128xf32> to vector<1x32xf32>
    %95 = vector.extract_strided_slice %90 {offsets = [0, 96], sizes = [1, 32], strides = [1, 1]} : vector<1x128xf32> to vector<1x32xf32>
    %96 = arith.mulf %93, %62 : vector<1x32xf32>
    %97 = arith.mulf %92, %94 : vector<1x32xf32>
    %98 = arith.addf %96, %97 : vector<1x32xf32>
    %99 = math.tanh %98 : vector<1x32xf32>
    %100 = arith.mulf %95, %99 : vector<1x32xf32>
    %101 = tpu.concatenate %100, %82 in 1 : vector<1x32xf32>, vector<1x64xf32> -> vector<1x96xf32>
    %cst_28 = arith.constant dense<0.000000e+00> : vector<1x256xf32>
    %102 = tpu.matmul %101, %1, %cst_28 {dimension_numbers = #tpu.dot_dimension_numbers<[1], [0], [0], [1], [0, 0, 1, 1], [], []>} : vector<1x96xf32>, vector<96x256xf32>, vector<1x256xf32> -> vector<1x256xf32>
    %103 = arith.addf %102, %2 : vector<1x256xf32>
    %104 = arith.negf %103 : vector<1x256xf32>
    %105 = math.exp %104 : vector<1x256xf32>
    %cst_29 = arith.constant 1.000000e+00 : f32
    %106 = vector.broadcast %cst_29 : f32 to vector<1x256xf32>
    %107 = arith.addf %106, %105 : vector<1x256xf32>
    %108 = arith.divf %106, %107 : vector<1x256xf32>
    %109 = math.tanh %103 : vector<1x256xf32>
    %110 = vector.extract_strided_slice %108 {offsets = [0, 0], sizes = [1, 64], strides = [1, 1]} : vector<1x256xf32> to vector<1x64xf32>
    %111 = vector.extract_strided_slice %108 {offsets = [0, 64], sizes = [1, 64], strides = [1, 1]} : vector<1x256xf32> to vector<1x64xf32>
    %112 = vector.extract_strided_slice %109 {offsets = [0, 128], sizes = [1, 64], strides = [1, 1]} : vector<1x256xf32> to vector<1x64xf32>
    %113 = vector.extract_strided_slice %108 {offsets = [0, 192], sizes = [1, 64], strides = [1, 1]} : vector<1x256xf32> to vector<1x64xf32>
    %114 = arith.mulf %111, %80 : vector<1x64xf32>
    %115 = arith.mulf %110, %112 : vector<1x64xf32>
    %116 = arith.addf %114, %115 : vector<1x64xf32>
    %117 = math.tanh %116 : vector<1x64xf32>
    %118 = arith.mulf %113, %117 : vector<1x64xf32>
    %c2 = arith.constant 2 : index
    %c0_30 = arith.constant 0 : index
    %119 = vector.load %arg9[%c2, %c0_30] : memref<8x64xf32, #tpu.memory_space<vmem>>, vector<1x64xf32>
    tpu.vector_store %arg9[%c2, %c0_30], %118 {strides = array<i32>} : memref<8x64xf32, #tpu.memory_space<vmem>>, vector<1x64xf32>,
    %cst_31 = arith.constant dense<0.000000e+00> : vector<1x128xf32>
    %120 = tpu.matmul %100, %0, %cst_31 {dimension_numbers = #tpu.dot_dimension_numbers<[1], [0], [0], [1], [0, 0, 1, 1], [], []>} : vector<1x32xf32>, vector<32x128xf32>, vector<1x128xf32> -> vector<1x128xf32>
    %121 = arith.addf %7, %120 : vector<1x128xf32>
    %122 = arith.negf %121 : vector<1x128xf32>
    %123 = math.exp %122 : vector<1x128xf32>
    %cst_32 = arith.constant 1.000000e+00 : f32
    %124 = vector.broadcast %cst_32 : f32 to vector<1x128xf32>
    %125 = arith.addf %124, %123 : vector<1x128xf32>
    %126 = arith.divf %124, %125 : vector<1x128xf32>
    %127 = math.tanh %121 : vector<1x128xf32>
    %128 = vector.extract_strided_slice %126 {offsets = [0, 0], sizes = [1, 32], strides = [1, 1]} : vector<1x128xf32> to vector<1x32xf32>
    %129 = vector.extract_strided_slice %126 {offsets = [0, 32], sizes = [1, 32], strides = [1, 1]} : vector<1x128xf32> to vector<1x32xf32>
    %130 = vector.extract_strided_slice %127 {offsets = [0, 64], sizes = [1, 32], strides = [1, 1]} : vector<1x128xf32> to vector<1x32xf32>
    %131 = vector.extract_strided_slice %126 {offsets = [0, 96], sizes = [1, 32], strides = [1, 1]} : vector<1x128xf32> to vector<1x32xf32>
    %132 = arith.mulf %129, %98 : vector<1x32xf32>
    %133 = arith.mulf %128, %130 : vector<1x32xf32>
    %134 = arith.addf %132, %133 : vector<1x32xf32>
    %135 = math.tanh %134 : vector<1x32xf32>
    %136 = arith.mulf %131, %135 : vector<1x32xf32>
    %137 = tpu.concatenate %136, %118 in 1 : vector<1x32xf32>, vector<1x64xf32> -> vector<1x96xf32>
    %cst_33 = arith.constant dense<0.000000e+00> : vector<1x256xf32>
    %138 = tpu.matmul %137, %1, %cst_33 {dimension_numbers = #tpu.dot_dimension_numbers<[1], [0], [0], [1], [0, 0, 1, 1], [], []>} : vector<1x96xf32>, vector<96x256xf32>, vector<1x256xf32> -> vector<1x256xf32>
    %139 = arith.addf %138, %2 : vector<1x256xf32>
    %140 = arith.negf %139 : vector<1x256xf32>
    %141 = math.exp %140 : vector<1x256xf32>
    %cst_34 = arith.constant 1.000000e+00 : f32
    %142 = vector.broadcast %cst_34 : f32 to vector<1x256xf32>
    %143 = arith.addf %142, %141 : vector<1x256xf32>
    %144 = arith.divf %142, %143 : vector<1x256xf32>
    %145 = math.tanh %139 : vector<1x256xf32>
    %146 = vector.extract_strided_slice %144 {offsets = [0, 0], sizes = [1, 64], strides = [1, 1]} : vector<1x256xf32> to vector<1x64xf32>
    %147 = vector.extract_strided_slice %144 {offsets = [0, 64], sizes = [1, 64], strides = [1, 1]} : vector<1x256xf32> to vector<1x64xf32>
    %148 = vector.extract_strided_slice %145 {offsets = [0, 128], sizes = [1, 64], strides = [1, 1]} : vector<1x256xf32> to vector<1x64xf32>
    %149 = vector.extract_strided_slice %144 {offsets = [0, 192], sizes = [1, 64], strides = [1, 1]} : vector<1x256xf32> to vector<1x64xf32>
    %150 = arith.mulf %147, %116 : vector<1x64xf32>
    %151 = arith.mulf %146, %148 : vector<1x64xf32>
    %152 = arith.addf %150, %151 : vector<1x64xf32>
    %153 = math.tanh %152 : vector<1x64xf32>
    %154 = arith.mulf %149, %153 : vector<1x64xf32>
    %c3 = arith.constant 3 : index
    %c0_35 = arith.constant 0 : index
    %155 = vector.load %arg9[%c3, %c0_35] : memref<8x64xf32, #tpu.memory_space<vmem>>, vector<1x64xf32>
    tpu.vector_store %arg9[%c3, %c0_35], %154 {strides = array<i32>} : memref<8x64xf32, #tpu.memory_space<vmem>>, vector<1x64xf32>,
    %cst_36 = arith.constant dense<0.000000e+00> : vector<1x128xf32>
    %156 = tpu.matmul %136, %0, %cst_36 {dimension_numbers = #tpu.dot_dimension_numbers<[1], [0], [0], [1], [0, 0, 1, 1], [], []>} : vector<1x32xf32>, vector<32x128xf32>, vector<1x128xf32> -> vector<1x128xf32>
    %157 = arith.addf %7, %156 : vector<1x128xf32>
    %158 = arith.negf %157 : vector<1x128xf32>
    %159 = math.exp %158 : vector<1x128xf32>
    %cst_37 = arith.constant 1.000000e+00 : f32
    %160 = vector.broadcast %cst_37 : f32 to vector<1x128xf32>
    %161 = arith.addf %160, %159 : vector<1x128xf32>
    %162 = arith.divf %160, %161 : vector<1x128xf32>
    %163 = math.tanh %157 : vector<1x128xf32>
    %164 = vector.extract_strided_slice %162 {offsets = [0, 0], sizes = [1, 32], strides = [1, 1]} : vector<1x128xf32> to vector<1x32xf32>
    %165 = vector.extract_strided_slice %162 {offsets = [0, 32], sizes = [1, 32], strides = [1, 1]} : vector<1x128xf32> to vector<1x32xf32>
    %166 = vector.extract_strided_slice %163 {offsets = [0, 64], sizes = [1, 32], strides = [1, 1]} : vector<1x128xf32> to vector<1x32xf32>
    %167 = vector.extract_strided_slice %162 {offsets = [0, 96], sizes = [1, 32], strides = [1, 1]} : vector<1x128xf32> to vector<1x32xf32>
    %168 = arith.mulf %165, %134 : vector<1x32xf32>
    %169 = arith.mulf %164, %166 : vector<1x32xf32>
    %170 = arith.addf %168, %169 : vector<1x32xf32>
    %171 = math.tanh %170 : vector<1x32xf32>
    %172 = arith.mulf %167, %171 : vector<1x32xf32>
    %173 = tpu.concatenate %172, %154 in 1 : vector<1x32xf32>, vector<1x64xf32> -> vector<1x96xf32>
    %cst_38 = arith.constant dense<0.000000e+00> : vector<1x256xf32>
    %174 = tpu.matmul %173, %1, %cst_38 {dimension_numbers = #tpu.dot_dimension_numbers<[1], [0], [0], [1], [0, 0, 1, 1], [], []>} : vector<1x96xf32>, vector<96x256xf32>, vector<1x256xf32> -> vector<1x256xf32>
    %175 = arith.addf %174, %2 : vector<1x256xf32>
    %176 = arith.negf %175 : vector<1x256xf32>
    %177 = math.exp %176 : vector<1x256xf32>
    %cst_39 = arith.constant 1.000000e+00 : f32
    %178 = vector.broadcast %cst_39 : f32 to vector<1x256xf32>
    %179 = arith.addf %178, %177 : vector<1x256xf32>
    %180 = arith.divf %178, %179 : vector<1x256xf32>
    %181 = math.tanh %175 : vector<1x256xf32>
    %182 = vector.extract_strided_slice %180 {offsets = [0, 0], sizes = [1, 64], strides = [1, 1]} : vector<1x256xf32> to vector<1x64xf32>
    %183 = vector.extract_strided_slice %180 {offsets = [0, 64], sizes = [1, 64], strides = [1, 1]} : vector<1x256xf32> to vector<1x64xf32>
    %184 = vector.extract_strided_slice %181 {offsets = [0, 128], sizes = [1, 64], strides = [1, 1]} : vector<1x256xf32> to vector<1x64xf32>
    %185 = vector.extract_strided_slice %180 {offsets = [0, 192], sizes = [1, 64], strides = [1, 1]} : vector<1x256xf32> to vector<1x64xf32>
    %186 = arith.mulf %183, %152 : vector<1x64xf32>
    %187 = arith.mulf %182, %184 : vector<1x64xf32>
    %188 = arith.addf %186, %187 : vector<1x64xf32>
    %189 = math.tanh %188 : vector<1x64xf32>
    %190 = arith.mulf %185, %189 : vector<1x64xf32>
    %c4 = arith.constant 4 : index
    %c0_40 = arith.constant 0 : index
    %191 = vector.load %arg9[%c4, %c0_40] : memref<8x64xf32, #tpu.memory_space<vmem>>, vector<1x64xf32>
    tpu.vector_store %arg9[%c4, %c0_40], %190 {strides = array<i32>} : memref<8x64xf32, #tpu.memory_space<vmem>>, vector<1x64xf32>,
    %cst_41 = arith.constant dense<0.000000e+00> : vector<1x128xf32>
    %192 = tpu.matmul %172, %0, %cst_41 {dimension_numbers = #tpu.dot_dimension_numbers<[1], [0], [0], [1], [0, 0, 1, 1], [], []>} : vector<1x32xf32>, vector<32x128xf32>, vector<1x128xf32> -> vector<1x128xf32>
    %193 = arith.addf %7, %192 : vector<1x128xf32>
    %194 = arith.negf %193 : vector<1x128xf32>
    %195 = math.exp %194 : vector<1x128xf32>
    %cst_42 = arith.constant 1.000000e+00 : f32
    %196 = vector.broadcast %cst_42 : f32 to vector<1x128xf32>
    %197 = arith.addf %196, %195 : vector<1x128xf32>
    %198 = arith.divf %196, %197 : vector<1x128xf32>
    %199 = math.tanh %193 : vector<1x128xf32>
    %200 = vector.extract_strided_slice %198 {offsets = [0, 0], sizes = [1, 32], strides = [1, 1]} : vector<1x128xf32> to vector<1x32xf32>
    %201 = vector.extract_strided_slice %198 {offsets = [0, 32], sizes = [1, 32], strides = [1, 1]} : vector<1x128xf32> to vector<1x32xf32>
    %202 = vector.extract_strided_slice %199 {offsets = [0, 64], sizes = [1, 32], strides = [1, 1]} : vector<1x128xf32> to vector<1x32xf32>
    %203 = vector.extract_strided_slice %198 {offsets = [0, 96], sizes = [1, 32], strides = [1, 1]} : vector<1x128xf32> to vector<1x32xf32>
    %204 = arith.mulf %201, %170 : vector<1x32xf32>
    %205 = arith.mulf %200, %202 : vector<1x32xf32>
    %206 = arith.addf %204, %205 : vector<1x32xf32>
    %207 = math.tanh %206 : vector<1x32xf32>
    %208 = arith.mulf %203, %207 : vector<1x32xf32>
    %209 = tpu.concatenate %208, %190 in 1 : vector<1x32xf32>, vector<1x64xf32> -> vector<1x96xf32>
    %cst_43 = arith.constant dense<0.000000e+00> : vector<1x256xf32>
    %210 = tpu.matmul %209, %1, %cst_43 {dimension_numbers = #tpu.dot_dimension_numbers<[1], [0], [0], [1], [0, 0, 1, 1], [], []>} : vector<1x96xf32>, vector<96x256xf32>, vector<1x256xf32> -> vector<1x256xf32>
    %211 = arith.addf %210, %2 : vector<1x256xf32>
    %212 = arith.negf %211 : vector<1x256xf32>
    %213 = math.exp %212 : vector<1x256xf32>
    %cst_44 = arith.constant 1.000000e+00 : f32
    %214 = vector.broadcast %cst_44 : f32 to vector<1x256xf32>
    %215 = arith.addf %214, %213 : vector<1x256xf32>
    %216 = arith.divf %214, %215 : vector<1x256xf32>
    %217 = math.tanh %211 : vector<1x256xf32>
    %218 = vector.extract_strided_slice %216 {offsets = [0, 0], sizes = [1, 64], strides = [1, 1]} : vector<1x256xf32> to vector<1x64xf32>
    %219 = vector.extract_strided_slice %216 {offsets = [0, 64], sizes = [1, 64], strides = [1, 1]} : vector<1x256xf32> to vector<1x64xf32>
    %220 = vector.extract_strided_slice %217 {offsets = [0, 128], sizes = [1, 64], strides = [1, 1]} : vector<1x256xf32> to vector<1x64xf32>
    %221 = vector.extract_strided_slice %216 {offsets = [0, 192], sizes = [1, 64], strides = [1, 1]} : vector<1x256xf32> to vector<1x64xf32>
    %222 = arith.mulf %219, %188 : vector<1x64xf32>
    %223 = arith.mulf %218, %220 : vector<1x64xf32>
    %224 = arith.addf %222, %223 : vector<1x64xf32>
    %225 = math.tanh %224 : vector<1x64xf32>
    %226 = arith.mulf %221, %225 : vector<1x64xf32>
    %c5 = arith.constant 5 : index
    %c0_45 = arith.constant 0 : index
    %227 = vector.load %arg9[%c5, %c0_45] : memref<8x64xf32, #tpu.memory_space<vmem>>, vector<1x64xf32>
    tpu.vector_store %arg9[%c5, %c0_45], %226 {strides = array<i32>} : memref<8x64xf32, #tpu.memory_space<vmem>>, vector<1x64xf32>,
    %cst_46 = arith.constant dense<0.000000e+00> : vector<1x128xf32>
    %228 = tpu.matmul %208, %0, %cst_46 {dimension_numbers = #tpu.dot_dimension_numbers<[1], [0], [0], [1], [0, 0, 1, 1], [], []>} : vector<1x32xf32>, vector<32x128xf32>, vector<1x128xf32> -> vector<1x128xf32>
    %229 = arith.addf %7, %228 : vector<1x128xf32>
    %230 = arith.negf %229 : vector<1x128xf32>
    %231 = math.exp %230 : vector<1x128xf32>
    %cst_47 = arith.constant 1.000000e+00 : f32
    %232 = vector.broadcast %cst_47 : f32 to vector<1x128xf32>
    %233 = arith.addf %232, %231 : vector<1x128xf32>
    %234 = arith.divf %232, %233 : vector<1x128xf32>
    %235 = math.tanh %229 : vector<1x128xf32>
    %236 = vector.extract_strided_slice %234 {offsets = [0, 0], sizes = [1, 32], strides = [1, 1]} : vector<1x128xf32> to vector<1x32xf32>
    %237 = vector.extract_strided_slice %234 {offsets = [0, 32], sizes = [1, 32], strides = [1, 1]} : vector<1x128xf32> to vector<1x32xf32>
    %238 = vector.extract_strided_slice %235 {offsets = [0, 64], sizes = [1, 32], strides = [1, 1]} : vector<1x128xf32> to vector<1x32xf32>
    %239 = vector.extract_strided_slice %234 {offsets = [0, 96], sizes = [1, 32], strides = [1, 1]} : vector<1x128xf32> to vector<1x32xf32>
    %240 = arith.mulf %237, %206 : vector<1x32xf32>
    %241 = arith.mulf %236, %238 : vector<1x32xf32>
    %242 = arith.addf %240, %241 : vector<1x32xf32>
    %243 = math.tanh %242 : vector<1x32xf32>
    %244 = arith.mulf %239, %243 : vector<1x32xf32>
    %245 = tpu.concatenate %244, %226 in 1 : vector<1x32xf32>, vector<1x64xf32> -> vector<1x96xf32>
    %cst_48 = arith.constant dense<0.000000e+00> : vector<1x256xf32>
    %246 = tpu.matmul %245, %1, %cst_48 {dimension_numbers = #tpu.dot_dimension_numbers<[1], [0], [0], [1], [0, 0, 1, 1], [], []>} : vector<1x96xf32>, vector<96x256xf32>, vector<1x256xf32> -> vector<1x256xf32>
    %247 = arith.addf %246, %2 : vector<1x256xf32>
    %248 = arith.negf %247 : vector<1x256xf32>
    %249 = math.exp %248 : vector<1x256xf32>
    %cst_49 = arith.constant 1.000000e+00 : f32
    %250 = vector.broadcast %cst_49 : f32 to vector<1x256xf32>
    %251 = arith.addf %250, %249 : vector<1x256xf32>
    %252 = arith.divf %250, %251 : vector<1x256xf32>
    %253 = math.tanh %247 : vector<1x256xf32>
    %254 = vector.extract_strided_slice %252 {offsets = [0, 0], sizes = [1, 64], strides = [1, 1]} : vector<1x256xf32> to vector<1x64xf32>
    %255 = vector.extract_strided_slice %252 {offsets = [0, 64], sizes = [1, 64], strides = [1, 1]} : vector<1x256xf32> to vector<1x64xf32>
    %256 = vector.extract_strided_slice %253 {offsets = [0, 128], sizes = [1, 64], strides = [1, 1]} : vector<1x256xf32> to vector<1x64xf32>
    %257 = vector.extract_strided_slice %252 {offsets = [0, 192], sizes = [1, 64], strides = [1, 1]} : vector<1x256xf32> to vector<1x64xf32>
    %258 = arith.mulf %255, %224 : vector<1x64xf32>
    %259 = arith.mulf %254, %256 : vector<1x64xf32>
    %260 = arith.addf %258, %259 : vector<1x64xf32>
    %261 = math.tanh %260 : vector<1x64xf32>
    %262 = arith.mulf %257, %261 : vector<1x64xf32>
    %c6 = arith.constant 6 : index
    %c0_50 = arith.constant 0 : index
    %263 = vector.load %arg9[%c6, %c0_50] : memref<8x64xf32, #tpu.memory_space<vmem>>, vector<1x64xf32>
    tpu.vector_store %arg9[%c6, %c0_50], %262 {strides = array<i32>} : memref<8x64xf32, #tpu.memory_space<vmem>>, vector<1x64xf32>,
    %cst_51 = arith.constant dense<0.000000e+00> : vector<1x128xf32>
    %264 = tpu.matmul %244, %0, %cst_51 {dimension_numbers = #tpu.dot_dimension_numbers<[1], [0], [0], [1], [0, 0, 1, 1], [], []>} : vector<1x32xf32>, vector<32x128xf32>, vector<1x128xf32> -> vector<1x128xf32>
    %265 = arith.addf %7, %264 : vector<1x128xf32>
    %266 = arith.negf %265 : vector<1x128xf32>
    %267 = math.exp %266 : vector<1x128xf32>
    %cst_52 = arith.constant 1.000000e+00 : f32
    %268 = vector.broadcast %cst_52 : f32 to vector<1x128xf32>
    %269 = arith.addf %268, %267 : vector<1x128xf32>
    %270 = arith.divf %268, %269 : vector<1x128xf32>
    %271 = math.tanh %265 : vector<1x128xf32>
    %272 = vector.extract_strided_slice %270 {offsets = [0, 0], sizes = [1, 32], strides = [1, 1]} : vector<1x128xf32> to vector<1x32xf32>
    %273 = vector.extract_strided_slice %270 {offsets = [0, 32], sizes = [1, 32], strides = [1, 1]} : vector<1x128xf32> to vector<1x32xf32>
    %274 = vector.extract_strided_slice %271 {offsets = [0, 64], sizes = [1, 32], strides = [1, 1]} : vector<1x128xf32> to vector<1x32xf32>
    %275 = vector.extract_strided_slice %270 {offsets = [0, 96], sizes = [1, 32], strides = [1, 1]} : vector<1x128xf32> to vector<1x32xf32>
    %276 = arith.mulf %273, %242 : vector<1x32xf32>
    %277 = arith.mulf %272, %274 : vector<1x32xf32>
    %278 = arith.addf %276, %277 : vector<1x32xf32>
    %279 = math.tanh %278 : vector<1x32xf32>
    %280 = arith.mulf %275, %279 : vector<1x32xf32>
    %281 = tpu.concatenate %280, %262 in 1 : vector<1x32xf32>, vector<1x64xf32> -> vector<1x96xf32>
    %cst_53 = arith.constant dense<0.000000e+00> : vector<1x256xf32>
    %282 = tpu.matmul %281, %1, %cst_53 {dimension_numbers = #tpu.dot_dimension_numbers<[1], [0], [0], [1], [0, 0, 1, 1], [], []>} : vector<1x96xf32>, vector<96x256xf32>, vector<1x256xf32> -> vector<1x256xf32>
    %283 = arith.addf %282, %2 : vector<1x256xf32>
    %284 = arith.negf %283 : vector<1x256xf32>
    %285 = math.exp %284 : vector<1x256xf32>
    %cst_54 = arith.constant 1.000000e+00 : f32
    %286 = vector.broadcast %cst_54 : f32 to vector<1x256xf32>
    %287 = arith.addf %286, %285 : vector<1x256xf32>
    %288 = arith.divf %286, %287 : vector<1x256xf32>
    %289 = math.tanh %283 : vector<1x256xf32>
    %290 = vector.extract_strided_slice %288 {offsets = [0, 0], sizes = [1, 64], strides = [1, 1]} : vector<1x256xf32> to vector<1x64xf32>
    %291 = vector.extract_strided_slice %288 {offsets = [0, 64], sizes = [1, 64], strides = [1, 1]} : vector<1x256xf32> to vector<1x64xf32>
    %292 = vector.extract_strided_slice %289 {offsets = [0, 128], sizes = [1, 64], strides = [1, 1]} : vector<1x256xf32> to vector<1x64xf32>
    %293 = vector.extract_strided_slice %288 {offsets = [0, 192], sizes = [1, 64], strides = [1, 1]} : vector<1x256xf32> to vector<1x64xf32>
    %294 = arith.mulf %291, %260 : vector<1x64xf32>
    %295 = arith.mulf %290, %292 : vector<1x64xf32>
    %296 = arith.addf %294, %295 : vector<1x64xf32>
    %297 = math.tanh %296 : vector<1x64xf32>
    %298 = arith.mulf %293, %297 : vector<1x64xf32>
    %c7 = arith.constant 7 : index
    %c0_55 = arith.constant 0 : index
    %299 = vector.load %arg9[%c7, %c0_55] : memref<8x64xf32, #tpu.memory_space<vmem>>, vector<1x64xf32>
    tpu.vector_store %arg9[%c7, %c0_55], %298 {strides = array<i32>} : memref<8x64xf32, #tpu.memory_space<vmem>>, vector<1x64xf32>,
    %c0_56 = arith.constant 0 : index
    %c0_57 = arith.constant 0 : index
    %300 = vector.load %arg9[%c0_56, %c0_57] : memref<8x64xf32, #tpu.memory_space<vmem>>, vector<8x64xf32>
    %c0_58 = arith.constant 0 : index
    %c0_59 = arith.constant 0 : index
    %301 = vector.load %arg6[%c0_58, %c0_59] : memref<64x1xf32, #tpu.memory_space<vmem>>, vector<64x1xf32>
    %cst_60 = arith.constant dense<0.000000e+00> : vector<8x1xf32>
    %302 = tpu.matmul %300, %301, %cst_60 {dimension_numbers = #tpu.dot_dimension_numbers<[1], [0], [0], [1], [0, 0, 1, 1], [], []>} : vector<8x64xf32>, vector<64x1xf32>, vector<8x1xf32> -> vector<8x1xf32>
    %c0_61 = arith.constant 0 : index
    %c0_62 = arith.constant 0 : index
    %303 = vector.load %arg7[%c0_61, %c0_62] : memref<1x1xf32, #tpu.memory_space<vmem>>, vector<1x1xf32>
    %304 = vector.broadcast %303 : vector<1x1xf32> to vector<8x1xf32>
    %305 = arith.addf %302, %304 : vector<8x1xf32>
    %c0_63 = arith.constant 0 : index
    %c0_64 = arith.constant 0 : index
    %306 = vector.load %arg8[%c0_63, %c0_64] : memref<8x1xf32, #tpu.memory_space<vmem>>, vector<8x1xf32>
    tpu.vector_store %arg8[%c0_63, %c0_64], %305 {strides = array<i32>} : memref<8x1xf32, #tpu.memory_space<vmem>>, vector<8x1xf32>,
    return
  }
}

</mosaic_0001>

<bundles_post_ra>
// kernel: decoder_forward.1
= control target key start
LH: loop header
LB: loop body
LE: loop exit
PB: predicated region body
PF: predicated region fallthrough
CT: control target
= control target key end

     0   :  { %v2533_v0 = vmov 0.0|0.0   ;;  %vm2534_vm0 = vmmov 0   ;;  %v2535_v8 = vmov 0.0   ;;  %vm66_vm1 = vcmask 261120   ;;  %s2536_s22 = smov 64   ;;  %s3096_s1 = inlined_call_operand.vmem [shape: f32[32,128], index: 1, kind: input, shape index: {}]   ;;  %s3097_s2 = inlined_call_operand.vmem [shape: f32[32,128], index: 2, kind: input, shape index: {}]   ;;  %s3098_s0 = inlined_call_operand.vmem [shape: f32[1,32], index: 0, kind: input, shape index: {}]   ;;  %s3099_s3 = inlined_call_operand.vmem [shape: f32[1,128], index: 3, kind: input, shape index: {}]   ;;  %s3100_s4 = inlined_call_operand.vmem [shape: f32[96,256], index: 4, kind: input, shape index: {}]   ;;  %s3101_s5 = inlined_call_operand.vmem [shape: f32[1,256], index: 5, kind: input, shape index: {}]   ;;  %s3102_s6 = inlined_call_operand.vmem [shape: f32[64,1], index: 6, kind: input, shape index: {}]   ;;  %s3103_s7 = inlined_call_operand.<no memory space> [shape: f32[1,1], index: 7, kind: input, shape index: {}]   ;;  %s3104_s8 = inlined_call_operand.vmem [shape: f32[8,1], index: 8, kind: output, shape index: {}]  }
   0x1   :  { %2109 = vmatprep.subr.bf16.mxu0 %v2533_v0  ;;  %v61_v1 = vld [vmem:[%s3096_s1] sm:$0xff]  ;;  %v62_v2 = vld [vmem:[%s3096_s1 + $0x8] sm:$0xff]  ;;  %2115 = vmatprep.subr.bf16.mxu1 %v2533_v0  ;;  %v63_v6 = vld [vmem:[%s3096_s1 + $0x10] sm:$0xff]  ;;  %vm254_vm2 = vcmask 785408   ;;  %vm355_vm3 = vcmask 516096   ;;  %vm1815_vm4 = vcmask 523264  }
   0x2   :  { %v31_v3 = vld [vmem:[%s3097_s2] sm:$0xff]  ;;  %v2110_v4 = vpack.c.bf16 %v62_v2, %v61_v1  ;;  %v32_v5 = vld [vmem:[%s3097_s2 + $0x8] sm:$0xff]  ;;  %v64_v7 = vld [vmem:[%s3096_s1 + $0x18] sm:$0xff]  ;;  %1999 = vmatprep.mubr.msk.f32.mxu0 %vm2534_vm0, %v2535_v8  ;;  %2010 = vmatprep.mubr.msk.f32.mxu1 %vm2534_vm0, %v2535_v8  ;;  %vm1889_vm5 = vcmask 7168  }
   0x3   :  { %v2608_v9 = vpack.c.bf16 %v32_v5, %v31_v3  ;;  %v33_v10 = vld [vmem:[%s3097_s2 + $0x10] sm:$0xff]  ;;  %v34_v11 = vld [vmem:[%s3097_s2 + $0x18] sm:$0xff]  ;;  %v2113_v12 = vpack.c.bf16 %v64_v7, %v63_v6  ;;  %v60_v14 = vld [vmem:[%s3098_s0] sm:$0x1] }
   0x4   :  { %2111 = vmatpush3.bf16.msra.mxu0 %v2110_v4  ;;  %v2618_v13 = vpack.c.bf16 %v34_v11, %v33_v10  ;;  %v65_v15 = vld [vmem:[%s3099_s3] sm:$0x1]  ;;  %s2537_s3 = smov 32   ;;  %v36_v32 = vld [vmem:[%s3100_s4 + $0x8] sm:$0xff]  ;;  %v38_v33 = vld [vmem:[%s3100_s4 + $0x18] sm:$0xff] }
   0x5   :  { %2117 = vmatpush3.bf16.msra.mxu1 %v2608_v9  ;;  %2112 = vmatprep.subr.bf16.mxu0 %v2533_v0  ;;  %v35_v34 = vld [vmem:[%s3100_s4] sm:$0xff]  ;;  %v2658_v35 = vpack.c.bf16 %v38_v33, %v36_v32  ;;  %v37_v36 = vld [vmem:[%s3100_s4 + $0x10] sm:$0xff]  ;;  %v40_v37 = vld [vmem:[%s3100_s4 + $0x28] sm:$0xff] }
   0x6   :  { %2118 = vmatprep.subr.bf16.mxu1 %v2533_v0  ;;  %v42_v38 = vld [vmem:[%s3100_s4 + $0x38] sm:$0xff]  ;;  %v2669_v39 = vpack.c.bf16 %v37_v36, %v35_v34  ;;  %v39_v41 = vld [vmem:[%s3100_s4 + $0x20] sm:$0xff]  ;;  %v41_v42 = vld [vmem:[%s3100_s4 + $0x30] sm:$0xff] }
   0x7   :  { %v2671_v40 = vpack.c.bf16 %v42_v38, %v40_v37  ;;  %v44_v43 = vld [vmem:[%s3100_s4 + $0x48] sm:$0xff]  ;;  %v46_v44 = vld [vmem:[%s3100_s4 + $0x58] sm:$0xff]  ;;  %v2688_v45 = vpack.c.bf16 %v41_v42, %v39_v41  ;;  %v43_v47 = vld [vmem:[%s3100_s4 + $0x40] sm:$0xff] }
   0x8   :  { %2114 = vmatpush3.bf16.msra.mxu0 %v2113_v12  ;;  %v2691_v46 = vpack.c.bf16 %v46_v44, %v44_v43  ;;  %v45_v48 = vld [vmem:[%s3100_s4 + $0x50] sm:$0xff]  ;;  %v48_v49 = vld [vmem:[%s3100_s4 + $0x68] sm:$0xff]  ;;  %v50_v50 = vld [vmem:[%s3100_s4 + $0x78] sm:$0xff]  ;;  %v244_v12 = vlaneseq }
   0x9   :  { %2120 = vmatpush3.bf16.msra.mxu1 %v2618_v13  ;;  %2122 = vmatprep.subr.bf16.mxu0 %v2658_v35  ;;  %v2706_v51 = vpack.c.bf16 %v45_v48, %v43_v47  ;;  %v2709_v53 = vpack.c.bf16 %v50_v50, %v48_v49  ;;  %v47_v54 = vld [vmem:[%s3100_s4 + $0x60] sm:$0xff]  ;;  %v49_v55 = vld [vmem:[%s3100_s4 + $0x70] sm:$0xff]  ;;  %v52_v56 = vld [vmem:[%s3100_s4 + $0x88] sm:$0xff] }
   0xa   :  { %2145 = vmatprep.subr.bf16.mxu1 %v2533_v0  ;;  %v54_v57 = vld [vmem:[%s3100_s4 + $0x98] sm:$0xff]  ;;  %v2725_v58 = vpack.c.bf16 %v49_v55, %v47_v54  ;;  %v51_v60 = vld [vmem:[%s3100_s4 + $0x80] sm:$0xff]  ;;  %v53_v61 = vld [vmem:[%s3100_s4 + $0x90] sm:$0xff] }
   0xb   :  { %2000 = vmatmul.mubr.msk.f32.vlgmr.msra.gmra.mrb[0].mxu0 %vm66_vm1, %v60_v14  ;;  %v2728_v59 = vpack.c.bf16 %v54_v57, %v52_v56  ;;  %v56_v62 = vld [vmem:[%s3100_s4 + $0xa8] sm:$0xff]  ;;  %v58_v63 = vld [vmem:[%s3100_s4 + $0xb8] sm:$0xff]  ;;  %v2743_v1 = vpack.c.bf16 %v53_v61, %v51_v60  ;;  %v55_v3 = vld [vmem:[%s3100_s4 + $0xa0] sm:$0xff]  ;;  %v245_v14 = vshrl.u32 %v244_v12, 7 }
   0xc   :  { %2011 = vmatmul.mubr.f32.vlgmr.msra.gmra.mrb[0].mxu1 %v2535_v8  ;;  %322 = vmatprep.mubr.f32.mxu0 %v2535_v8  ;;  %v2746_v2 = vpack.c.bf16 %v58_v63, %v56_v62  ;;  %v57_v4 = vld [vmem:[%s3100_s4 + $0xb0] sm:$0xff] }
   0xd   :  { %2147 = vmatpush3.bf16.msra.mxu1 %v2608_v9  ;;  %2021 = vmatprep.mubr.msk.f32.mxu1 %vm2534_vm0, %v2535_v8  ;;  %v2755_v5 = vpack.c.bf16 %v57_v4, %v55_v3 }
   0xe   :  { %2148 = vmatprep.subr.bf16.mxu1 %v2533_v0  ;;  %2124 = vmatpush1.bf16.msra.mxu0 %v2669_v39 }
   0xf   :  { %2126 = vmatprep.subr.bf16.mxu0 %v2671_v40 }
  0x11   :  { %2150 = vmatpush3.bf16.msra.mxu1 %v2618_v13 }
  0x12   :  { %2152 = vmatprep.subr.bf16.mxu1 %v2658_v35  ;;  %2128 = vmatpush1.bf16.msra.mxu0 %v2688_v45 }
  0x13   :  { %2130 = vmatprep.subr.bf16.mxu0 %v2691_v46 }
  0x16   :  { %2132 = vmatpush1.bf16.msra.mxu0 %v2706_v51 }
  0x17   :  { %2134 = vmatprep.subr.bf16.mxu0 %v2709_v53 }
  0x1a   :  { %2136 = vmatpush1.bf16.msra.mxu0 %v2725_v58 }
  0x1b   :  { %2138 = vmatprep.subr.bf16.mxu0 %v2728_v59 }
  0x1e   :  { %2140 = vmatpush1.bf16.msra.mxu0 %v2743_v1 }
  0x1f   :  { %2142 = vmatprep.subr.bf16.mxu0 %v2746_v2 }
  0x22   :  { %2144 = vmatpush1.bf16.msra.mxu0 %v2755_v5 }
  0x23   :  { %2175 = vmatprep.subr.bf16.mxu0 %v2533_v0 }
  0xde   :  { %v136_v16 = vpop.f32.mrb[0].mxu0 }
  0xdf   :  { %v2637_v17 = vadd.f32 %v136_v16, %v65_v15  ;;  %v2001_v18 = vpop.f32.mrb[1].mxu0  ;;  %v209_v19 = vpop.f32.mrb[0].mxu1  ;;  %v246_v15 = vsub.s32 0, %v245_v14  ;;  %v59_v16 = vld [vmem:[%s3101_s5] sm:$0x3]  ;;  %s2538_s5 = smov 96  }
  0xe0   :  { %v2012_v20 = vpop.f32.mrb[1].mxu1 }
  0xe1   :  { %v213_v21 = vadd.f32 %v209_v19, %v2637_v17  ;;  %v2787_v18 = vrot.slane %v59_v16, %v246_v15 }
  0xe3   :  { %2373 = vtanh.f32 %v213_v21  ;;  %v1896_v23 = vmul.f32 -1.442695, %v213_v21 }
  0xe5   :  { %2375 = vpow2.f32 %v1896_v23 }
  0xed   :  { %v2374_v22 = vpop.eup %2373 }
  0xee   :  { %223 = vrot.lane.b32.xlu0 %v2374_v22, %s2536_s22 }
  0xef   :  { %v2376_v24 = vpop.eup %2375 }
  0xf0   :  { %v217_v25 = vadd.f32 1.0, %v2376_v24 }
  0xf2   :  { %2377 = vrcp.f32 %v217_v25 }
  0xfc   :  { %v2641_v26 = vpop.eup %2377 }
  0xfd   :  { %v221_v29 = vmul.f32 0.0, %v2641_v26 }
 0x160   :  { %v224_v27 = vpop.permute.xlu0 %223 }
 0x161   :  { %v226_v28 = vmul.f32 %v2641_v26, %v224_v27 }
 0x163   :  { %228 = vrot.lane.b32.xlu0 %v226_v28, %s2537_s3 }
 0x1d5   :  { %v229_v30 = vpop.permute.xlu0 %228 }
 0x1d6   :  { %v2646_v31 = vadd.f32 %v229_v30, %v221_v29 }
 0x1d8   :  { %2379 = vtanh.f32 %v2646_v31 }
 0x1e2   :  { %v2380_v52 = vpop.eup %2379 }
 0x1e3   :  { %234 = vrot.lane.b32.xlu1 %v2380_v52, %s2536_s22 }
 0x255   :  { %v235_v6 = vpop.permute.xlu1 %234 }
 0x256   :  { %v237_v7 = vmul.f32 %v2641_v26, %v235_v6  ;;  %v250_v26 = vsub.s32 1, %v245_v14 }
 0x258   :  { %239 = vrot.lane.b32.xlu1 %v237_v7, %s2537_s3  ;;  %v2791_v27 = vrot.slane %v59_v16, %v250_v26 }
 0x2ca   :  { %v240_v10 = vpop.permute.xlu1 %239 }
 0x2cb   :  { %v242_v11 = vsel %vm66_vm1, %v240_v10, 0.0  ;;  %2022 = vmatmul.mubr.msk.f32.vlgmr.msra.gmra.mrb[2].mxu1 %vm66_vm1, %v240_v10 }
 0x2cc   :  { %1897 = vmatmul.mubr.msk.f32.vlgmr.msra.gmra.mrb[2].mxu0 %vm254_vm2, %v242_v11  ;;  %2154 = vmatpush1.bf16.msra.mxu1 %v2669_v39 }
 0x2cd   :  { %2177 = vmatpush3.bf16.msra.mxu0 %v2608_v9  ;;  %2032 = vmatprep.mubr.msk.f32.mxu0 %vm2534_vm0, %v2535_v8 }
 0x2ce   :  { %2178 = vmatprep.subr.bf16.mxu0 %v2533_v0  ;;  %2156 = vmatprep.subr.bf16.mxu1 %v2671_v40 }
 0x2cf   :  { %529 = vmatprep.mubr.f32.mxu1 %v2535_v8 }
 0x2d0   :  { %2158 = vmatpush1.bf16.msra.mxu1 %v2688_v45 }
 0x2d1   :  { %2180 = vmatpush3.bf16.msra.mxu0 %v2618_v13  ;;  %2160 = vmatprep.subr.bf16.mxu1 %v2691_v46 }
 0x2d2   :  { %2182 = vmatprep.subr.bf16.mxu0 %v2658_v35 }
 0x2d4   :  { %2162 = vmatpush1.bf16.msra.mxu1 %v2706_v51 }
 0x2d5   :  { %2164 = vmatprep.subr.bf16.mxu1 %v2709_v53 }
 0x2d8   :  { %2166 = vmatpush1.bf16.msra.mxu1 %v2725_v58 }
 0x2d9   :  { %2168 = vmatprep.subr.bf16.mxu1 %v2728_v59 }
 0x2dc   :  { %2170 = vmatpush1.bf16.msra.mxu1 %v2743_v1 }
 0x2dd   :  { %2172 = vmatprep.subr.bf16.mxu1 %v2746_v2 }
 0x2e0   :  { %2174 = vmatpush1.bf16.msra.mxu1 %v2755_v5 }
 0x2e1   :  { %2205 = vmatprep.subr.bf16.mxu1 %v2533_v0 }
 0x39e   :  { %v425_v19 = vpop.f32.mrb[2].mxu1 }
 0x39f   :  { %v429_v20 = vadd.f32 %v425_v19, %v2637_v17  ;;  %v324_v21 = vpop.f32.mrb[2].mxu0  ;;  %v2023_v22 = vpop.f32.mrb[3].mxu1 }
 0x3a0   :  { %v325_v23 = vadd.f32 %v324_v21, %v2787_v18  ;;  %v326_v24 = vpop.f32.mrb[3].mxu0 }
 0x3a1   :  { %2381 = vtanh.f32 %v429_v20  ;;  %v327_v29 = vadd.f32 %v326_v24, %v2791_v27  ;;  %v1901_v37 = vmul.f32 -1.442695, %v429_v20 }
 0x3a2   :  { %v1898_v25 = vmul.f32 -1.442695, %v325_v23 }
 0x3a3   :  { %v1899_v63 = vmul.f32 -1.442695, %v327_v29 }
 0x3a4   :  { %2383 = vpow2.f32 %v1898_v25 }
 0x3a5   :  { %2385 = vtanh.f32 %v327_v29 }
 0x3ab   :  { %v2382_v28 = vpop.eup %2381 }
 0x3ac   :  { %439 = vrot.lane.b32.xlu0 %v2382_v28, %s2536_s22 }
 0x3ae   :  { %v2384_v30 = vpop.eup %2383 }
 0x3af   :  { %v335_v32 = vadd.f32 1.0, %v2384_v30  ;;  %v2386_v33 = vpop.eup %2385 }
 0x3b1   :  { %2387 = vrcp.f32 %v335_v32 }
 0x3b2   :  { %2389 = vpow2.f32 %v1901_v37 }
 0x3bb   :  { %v2388_v34 = vpop.eup %2387 }
 0x3bc   :  { %v343_v36 = vmul.f32 %v2388_v34, %v2386_v33  ;;  %v2390_v38 = vpop.eup %2389  ;;  %v342_v12 = vmul.f32 0.0, %v2388_v34 }
 0x3bd   :  { %v433_v41 = vadd.f32 1.0, %v2390_v38 }
 0x3bf   :  { %2391 = vrcp.f32 %v433_v41 }
 0x3c9   :  { %v2392_v42 = vpop.eup %2391 }
 0x3ca   :  { %v437_v47 = vmul.f32 %v2392_v42, %v2646_v31 }
 0x41e   :  { %v440_v43 = vpop.permute.xlu0 %439 }
 0x41f   :  { %v442_v44 = vmul.f32 %v2392_v42, %v440_v43 }
 0x421   :  { %444 = vrot.lane.b32.xlu1 %v442_v44, %s2537_s3 }
 0x493   :  { %v445_v48 = vpop.permute.xlu1 %444 }
 0x494   :  { %v447_v49 = vadd.f32 %v445_v48, %v437_v47 }
 0x496   :  { %2393 = vtanh.f32 %v447_v49 }
 0x4a0   :  { %v2394_v50 = vpop.eup %2393 }
 0x4a1   :  { %450 = vrot.lane.b32.xlu0 %v2394_v50, %s2536_s22 }
 0x513   :  { %v451_v52 = vpop.permute.xlu0 %450 }
 0x514   :  { %v453_v54 = vmul.f32 %v2392_v42, %v451_v52 }
 0x516   :  { %455 = vrot.lane.b32.xlu1 %v453_v54, %s2537_s3 }
 0x588   :  { %v456_v55 = vpop.permute.xlu1 %455 }
 0x589   :  { %2033 = vmatmul.mubr.msk.f32.vlgmr.msra.gmra.mrb[4].mxu0 %vm66_vm1, %v456_v55 }
 0x58a   :  { %2184 = vmatpush1.bf16.msra.mxu0 %v2669_v39  ;;  %735 = vmatprep.mubr.f32.mxu0 %v2535_v8 }
 0x58b   :  { %2186 = vmatprep.subr.bf16.mxu0 %v2671_v40 }
 0x58e   :  { %2188 = vmatpush1.bf16.msra.mxu0 %v2688_v45 }
 0x58f   :  { %2190 = vmatprep.subr.bf16.mxu0 %v2691_v46 }
 0x592   :  { %2192 = vmatpush1.bf16.msra.mxu0 %v2706_v51 }
 0x593   :  { %2194 = vmatprep.subr.bf16.mxu0 %v2709_v53 }
 0x596   :  { %2196 = vmatpush1.bf16.msra.mxu0 %v2725_v58 }
 0x597   :  { %2198 = vmatprep.subr.bf16.mxu0 %v2728_v59 }
 0x59a   :  { %2200 = vmatpush1.bf16.msra.mxu0 %v2743_v1 }
 0x59b   :  { %2202 = vmatprep.subr.bf16.mxu0 %v2746_v2 }
 0x59e   :  { %2204 = vmatpush1.bf16.msra.mxu0 %v2755_v5 }
 0x59f   :  { %2235 = vmatprep.subr.bf16.mxu0 %v2533_v0 }
 0x65c   :  { %v631_v31 = vpop.f32.mrb[4].mxu0 }
 0x65d   :  { %v635_v56 = vadd.f32 %v631_v31, %v2637_v17  ;;  %v2034_v57 = vpop.f32.mrb[5].mxu0 }
 0x65f   :  { %2395 = vtanh.f32 %v635_v56  ;;  %v1906_v61 = vmul.f32 -1.442695, %v635_v56 }
 0x661   :  { %2397 = vpow2.f32 %v1906_v61 }
 0x662   :  { %2399 = vpow2.f32 %v1899_v63 }
 0x669   :  { %v2396_v60 = vpop.eup %2395 }
 0x66a   :  { %645 = vrot.lane.b32.xlu0 %v2396_v60, %s2536_s22 }
 0x66b   :  { %v2398_v62 = vpop.eup %2397 }
 0x66c   :  { %v639_v3 = vadd.f32 1.0, %v2398_v62  ;;  %v2400_v4 = vpop.eup %2399 }
 0x66d   :  { %v336_v11 = vadd.f32 1.0, %v2400_v4 }
 0x66e   :  { %345 = vrot.lane.b32.xlu0 %v343_v36, %s2536_s22  ;;  %2401 = vrcp.f32 %v639_v3 }
 0x66f   :  { %2403 = vrcp.f32 %v336_v11 }
 0x678   :  { %v2402_v6 = vpop.eup %2401 }
 0x679   :  { %v2404_v16 = vpop.eup %2403  ;;  %v643_v21 = vmul.f32 %v2402_v6, %v447_v49 }
 0x6dc   :  { %v646_v7 = vpop.permute.xlu0 %645 }
 0x6dd   :  { %v648_v10 = vmul.f32 %v2402_v6, %v646_v7 }
 0x6df   :  { %650 = vrot.lane.b32.xlu1 %v648_v10, %s2537_s3 }
 0x6e0   :  { %v346_v14 = vpop.permute.xlu0 %345 }
 0x6e1   :  { %v2817_v15 = vadd.f32 %v346_v14, %v342_v12 }
 0x6e3   :  { %2405 = vtanh.f32 %v2817_v15 }
 0x6ed   :  { %v2406_v19 = vpop.eup %2405 }
 0x6ee   :  { %v2820_v20 = vmul.f32 %v2406_v19, %v2404_v16 }
 0x6f0   :  { %458 = vrot.lane.b32.xlu0 %v2820_v20, %s2538_s5 }
 0x751   :  { %v651_v22 = vpop.permute.xlu1 %650 }
 0x752   :  { %v2824_v23 = vadd.f32 %v651_v22, %v643_v21 }
 0x754   :  { %2407 = vtanh.f32 %v2824_v23 }
 0x75e   :  { %v2408_v24 = vpop.eup %2407 }
 0x75f   :  { %656 = vrot.lane.b32.xlu1 %v2408_v24, %s2536_s22 }
 0x762   :  { %v459_v25 = vpop.permute.xlu0 %458 }
 0x763   :  { %v461_v26 = vsel %vm66_vm1, %v456_v55, %v459_v25 }
 0x764   :  { %1902 = vmatmul.mubr.msk.f32.vlgmr.msra.gmra.mrb[4].mxu1 %vm254_vm2, %v461_v26 }
 0x765   :  { %2207 = vmatpush3.bf16.msra.mxu1 %v2608_v9  ;;  %2043 = vmatprep.mubr.msk.f32.mxu1 %vm2534_vm0, %v2535_v8 }
 0x766   :  { %2208 = vmatprep.subr.bf16.mxu1 %v2533_v0 }
 0x769   :  { %2210 = vmatpush3.bf16.msra.mxu1 %v2618_v13 }
 0x76a   :  { %2212 = vmatprep.subr.bf16.mxu1 %v2658_v35 }
 0x7d1   :  { %v657_v28 = vpop.permute.xlu1 %656 }
 0x7d2   :  { %v659_v29 = vmul.f32 %v2402_v6, %v657_v28 }
 0x7d4   :  { %661 = vrot.lane.b32.xlu1 %v659_v29, %s2537_s3 }
 0x837   :  { %v531_v30 = vpop.f32.mrb[4].mxu1 }
 0x838   :  { %v532_v32 = vadd.f32 %v531_v30, %v2787_v18  ;;  %v533_v33 = vpop.f32.mrb[5].mxu1 }
 0x839   :  { %v534_v36 = vadd.f32 %v533_v33, %v2791_v27 }
 0x83a   :  { %v1903_v34 = vmul.f32 -1.442695, %v532_v32 }
 0x83b   :  { %v1904_v55 = vmul.f32 -1.442695, %v534_v36 }
 0x83c   :  { %2409 = vpow2.f32 %v1903_v34 }
 0x83d   :  { %2411 = vtanh.f32 %v534_v36 }
 0x846   :  { %v2410_v37 = vpop.eup %2409  ;;  %v662_v38 = vpop.permute.xlu1 %661 }
 0x847   :  { %v542_v41 = vadd.f32 1.0, %v2410_v37  ;;  %2044 = vmatmul.mubr.msk.f32.vlgmr.msra.gmra.mrb[6].mxu1 %vm66_vm1, %v662_v38  ;;  %v2412_v42 = vpop.eup %2411 }
 0x848   :  { %2214 = vmatpush1.bf16.msra.mxu1 %v2669_v39  ;;  %941 = vmatprep.mubr.f32.mxu1 %v2535_v8 }
 0x849   :  { %2413 = vrcp.f32 %v542_v41  ;;  %2216 = vmatprep.subr.bf16.mxu1 %v2671_v40 }
 0x84c   :  { %2218 = vmatpush1.bf16.msra.mxu1 %v2688_v45 }
 0x84d   :  { %2220 = vmatprep.subr.bf16.mxu1 %v2691_v46 }
 0x850   :  { %2222 = vmatpush1.bf16.msra.mxu1 %v2706_v51 }
 0x851   :  { %2224 = vmatprep.subr.bf16.mxu1 %v2709_v53 }
 0x853   :  { %v2414_v43 = vpop.eup %2413 }
 0x854   :  { %v550_v44 = vmul.f32 %v2414_v43, %v2412_v42  ;;  %2226 = vmatpush1.bf16.msra.mxu1 %v2725_v58  ;;  %v549_v63 = vmul.f32 %v2414_v43, %v2817_v15 }
 0x855   :  { %2228 = vmatprep.subr.bf16.mxu1 %v2728_v59 }
 0x858   :  { %2230 = vmatpush1.bf16.msra.mxu1 %v2743_v1 }
 0x859   :  { %2232 = vmatprep.subr.bf16.mxu1 %v2746_v2 }
 0x85c   :  { %2234 = vmatpush1.bf16.msra.mxu1 %v2755_v5 }
 0x85d   :  { %2265 = vmatprep.subr.bf16.mxu1 %v2533_v0 }
 0x91a   :  { %v837_v47 = vpop.f32.mrb[6].mxu1 }
 0x91b   :  { %v841_v48 = vadd.f32 %v837_v47, %v2637_v17  ;;  %v2045_v49 = vpop.f32.mrb[7].mxu1 }
 0x91d   :  { %2415 = vtanh.f32 %v841_v48  ;;  %v1911_v52 = vmul.f32 -1.442695, %v841_v48 }
 0x91f   :  { %2417 = vpow2.f32 %v1911_v52 }
 0x920   :  { %2419 = vpow2.f32 %v1904_v55 }
 0x927   :  { %v2416_v50 = vpop.eup %2415 }
 0x928   :  { %851 = vrot.lane.b32.xlu0 %v2416_v50, %s2536_s22 }
 0x929   :  { %v2418_v54 = vpop.eup %2417 }
 0x92a   :  { %v845_v31 = vadd.f32 1.0, %v2418_v54  ;;  %v2420_v56 = vpop.eup %2419 }
 0x92b   :  { %v543_v62 = vadd.f32 1.0, %v2420_v56 }
 0x92c   :  { %552 = vrot.lane.b32.xlu0 %v550_v44, %s2536_s22  ;;  %2421 = vrcp.f32 %v845_v31 }
 0x92d   :  { %2423 = vrcp.f32 %v543_v62 }
 0x936   :  { %v2422_v57 = vpop.eup %2421 }
 0x937   :  { %v2424_v6 = vpop.eup %2423  ;;  %v849_v11 = vmul.f32 %v2422_v57, %v2824_v23 }
 0x99a   :  { %v852_v60 = vpop.permute.xlu0 %851 }
 0x99b   :  { %v854_v61 = vmul.f32 %v2422_v57, %v852_v60 }
 0x99d   :  { %856 = vrot.lane.b32.xlu1 %v854_v61, %s2537_s3 }
 0x99e   :  { %v553_v3 = vpop.permute.xlu0 %552 }
 0x99f   :  { %v555_v4 = vadd.f32 %v553_v3, %v549_v63 }
 0x9a1   :  { %2425 = vtanh.f32 %v555_v4 }
 0x9ab   :  { %v2426_v7 = vpop.eup %2425 }
 0x9ac   :  { %v2858_v10 = vmul.f32 %v2426_v7, %v2424_v6 }
 0x9ae   :  { %664 = vrot.lane.b32.xlu0 %v2858_v10, %s2538_s5 }
 0xa0f   :  { %v857_v12 = vpop.permute.xlu1 %856 }
 0xa10   :  { %v2863_v14 = vadd.f32 %v857_v12, %v849_v11 }
 0xa12   :  { %2427 = vtanh.f32 %v2863_v14 }
 0xa1c   :  { %v2428_v16 = vpop.eup %2427 }
 0xa1d   :  { %862 = vrot.lane.b32.xlu1 %v2428_v16, %s2536_s22 }
 0xa20   :  { %v665_v15 = vpop.permute.xlu0 %664 }
 0xa21   :  { %v667_v19 = vsel %vm66_vm1, %v662_v38, %v665_v15 }
 0xa22   :  { %1907 = vmatmul.mubr.msk.f32.vlgmr.msra.gmra.mrb[6].mxu0 %vm254_vm2, %v667_v19 }
 0xa23   :  { %2237 = vmatpush3.bf16.msra.mxu0 %v2608_v9  ;;  %2054 = vmatprep.mubr.msk.f32.mxu0 %vm2534_vm0, %v2535_v8 }
 0xa24   :  { %2238 = vmatprep.subr.bf16.mxu0 %v2533_v0 }
 0xa27   :  { %2240 = vmatpush3.bf16.msra.mxu0 %v2618_v13 }
 0xa28   :  { %2242 = vmatprep.subr.bf16.mxu0 %v2658_v35 }
 0xa8f   :  { %v863_v21 = vpop.permute.xlu1 %862 }
 0xa90   :  { %v865_v22 = vmul.f32 %v2422_v57, %v863_v21 }
 0xa92   :  { %867 = vrot.lane.b32.xlu1 %v865_v22, %s2537_s3 }
 0xaf5   :  { %v737_v23 = vpop.f32.mrb[6].mxu0 }
 0xaf6   :  { %v738_v24 = vadd.f32 %v737_v23, %v2787_v18  ;;  %v739_v25 = vpop.f32.mrb[7].mxu0 }
 0xaf7   :  { %v740_v28 = vadd.f32 %v739_v25, %v2791_v27 }
 0xaf8   :  { %v1908_v26 = vmul.f32 -1.442695, %v738_v24 }
 0xaf9   :  { %v1909_v37 = vmul.f32 -1.442695, %v740_v28 }
 0xafa   :  { %2429 = vpow2.f32 %v1908_v26 }
 0xafb   :  { %2431 = vtanh.f32 %v740_v28 }
 0xb04   :  { %v2430_v29 = vpop.eup %2429  ;;  %v868_v30 = vpop.permute.xlu1 %867 }
 0xb05   :  { %v748_v32 = vadd.f32 1.0, %v2430_v29  ;;  %2055 = vmatmul.mubr.msk.f32.vlgmr.msra.gmra.mrb[8].mxu0 %vm66_vm1, %v868_v30  ;;  %v2432_v33 = vpop.eup %2431 }
 0xb06   :  { %2244 = vmatpush1.bf16.msra.mxu0 %v2669_v39  ;;  %1147 = vmatprep.mubr.f32.mxu0 %v2535_v8 }
 0xb07   :  { %2433 = vrcp.f32 %v748_v32  ;;  %2246 = vmatprep.subr.bf16.mxu0 %v2671_v40 }
 0xb08   :  { %2435 = vpow2.f32 %v1909_v37 }
 0xb0a   :  { %2248 = vmatpush1.bf16.msra.mxu0 %v2688_v45 }
 0xb0b   :  { %2250 = vmatprep.subr.bf16.mxu0 %v2691_v46 }
 0xb0e   :  { %2252 = vmatpush1.bf16.msra.mxu0 %v2706_v51 }
 0xb0f   :  { %2254 = vmatprep.subr.bf16.mxu0 %v2709_v53 }
 0xb11   :  { %v2434_v34 = vpop.eup %2433 }
 0xb12   :  { %v756_v36 = vmul.f32 %v2434_v34, %v2432_v33  ;;  %2256 = vmatpush1.bf16.msra.mxu0 %v2725_v58  ;;  %v2436_v38 = vpop.eup %2435  ;;  %v755_v42 = vmul.f32 %v2434_v34, %v555_v4 }
 0xb13   :  { %2258 = vmatprep.subr.bf16.mxu0 %v2728_v59  ;;  %v749_v41 = vadd.f32 1.0, %v2436_v38 }
 0xb14   :  { %758 = vrot.lane.b32.xlu1 %v756_v36, %s2536_s22 }
 0xb15   :  { %2437 = vrcp.f32 %v749_v41 }
 0xb16   :  { %2260 = vmatpush1.bf16.msra.mxu0 %v2743_v1 }
 0xb17   :  { %2262 = vmatprep.subr.bf16.mxu0 %v2746_v2 }
 0xb1a   :  { %2264 = vmatpush1.bf16.msra.mxu0 %v2755_v5 }
 0xb1b   :  { %2295 = vmatprep.subr.bf16.mxu0 %v2533_v0 }
 0xb1f   :  { %v2438_v47 = vpop.eup %2437 }
 0xb86   :  { %v759_v43 = vpop.permute.xlu1 %758 }
 0xb87   :  { %v761_v44 = vadd.f32 %v759_v43, %v755_v42 }
 0xb89   :  { %2439 = vtanh.f32 %v761_v44 }
 0xb93   :  { %v2440_v48 = vpop.eup %2439 }
 0xb94   :  { %v2893_v49 = vmul.f32 %v2440_v48, %v2438_v47 }
 0xb96   :  { %870 = vrot.lane.b32.xlu1 %v2893_v49, %s2538_s5 }
 0xbd8   :  { %v1043_v50 = vpop.f32.mrb[8].mxu0 }
 0xbd9   :  { %v1047_v52 = vadd.f32 %v1043_v50, %v2637_v17  ;;  %v2056_v54 = vpop.f32.mrb[9].mxu0 }
 0xbdb   :  { %2441 = vtanh.f32 %v1047_v52  ;;  %v1916_v57 = vmul.f32 -1.442695, %v1047_v52 }
 0xbdd   :  { %2443 = vpow2.f32 %v1916_v57 }
 0xbe5   :  { %v2442_v55 = vpop.eup %2441 }
 0xbe6   :  { %1057 = vrot.lane.b32.xlu0 %v2442_v55, %s2536_s22 }
 0xbe7   :  { %v2444_v60 = vpop.eup %2443 }
 0xbe8   :  { %v1051_v61 = vadd.f32 1.0, %v2444_v60 }
 0xbea   :  { %2445 = vrcp.f32 %v1051_v61 }
 0xbf4   :  { %v2446_v62 = vpop.eup %2445 }
 0xbf5   :  { %v1055_v4 = vmul.f32 %v2446_v62, %v2863_v14 }
 0xc08   :  { %v871_v31 = vpop.permute.xlu1 %870 }
 0xc09   :  { %v873_v56 = vsel %vm66_vm1, %v868_v30, %v871_v31 }
 0xc0a   :  { %1912 = vmatmul.mubr.msk.f32.vlgmr.msra.gmra.mrb[8].mxu1 %vm254_vm2, %v873_v56 }
 0xc0b   :  { %2267 = vmatpush3.bf16.msra.mxu1 %v2608_v9  ;;  %2065 = vmatprep.mubr.msk.f32.mxu1 %vm2534_vm0, %v2535_v8 }
 0xc0c   :  { %2268 = vmatprep.subr.bf16.mxu1 %v2533_v0 }
 0xc0f   :  { %2270 = vmatpush3.bf16.msra.mxu1 %v2618_v13 }
 0xc10   :  { %2272 = vmatprep.subr.bf16.mxu1 %v2658_v35 }
 0xc58   :  { %v1058_v63 = vpop.permute.xlu0 %1057 }
 0xc59   :  { %v1060_v3 = vmul.f32 %v2446_v62, %v1058_v63 }
 0xc5b   :  { %1062 = vrot.lane.b32.xlu0 %v1060_v3, %s2537_s3 }
 0xccd   :  { %v1063_v6 = vpop.permute.xlu0 %1062 }
 0xcce   :  { %v2909_v7 = vadd.f32 %v1063_v6, %v1055_v4 }
 0xcd0   :  { %2447 = vtanh.f32 %v2909_v7 }
 0xcda   :  { %v2448_v11 = vpop.eup %2447 }
 0xcdb   :  { %1068 = vrot.lane.b32.xlu0 %v2448_v11, %s2536_s22 }
 0xcdd   :  { %v943_v12 = vpop.f32.mrb[8].mxu1 }
 0xcde   :  { %v944_v16 = vadd.f32 %v943_v12, %v2787_v18  ;;  %v945_v15 = vpop.f32.mrb[9].mxu1 }
 0xcdf   :  { %v946_v21 = vadd.f32 %v945_v15, %v2791_v27 }
 0xce0   :  { %v1913_v19 = vmul.f32 -1.442695, %v944_v16 }
 0xce1   :  { %v1914_v29 = vmul.f32 -1.442695, %v946_v21 }
 0xce2   :  { %2449 = vpow2.f32 %v1913_v19 }
 0xce3   :  { %2451 = vtanh.f32 %v946_v21 }
 0xcec   :  { %v2450_v22 = vpop.eup %2449 }
 0xced   :  { %v954_v23 = vadd.f32 1.0, %v2450_v22  ;;  %v2452_v14 = vpop.eup %2451 }
 0xcef   :  { %2453 = vrcp.f32 %v954_v23 }
 0xcf0   :  { %2455 = vpow2.f32 %v1914_v29 }
 0xcf9   :  { %v2454_v24 = vpop.eup %2453 }
 0xcfa   :  { %v962_v25 = vmul.f32 %v2454_v24, %v2452_v14  ;;  %v2456_v30 = vpop.eup %2455  ;;  %v961_v33 = vmul.f32 %v2454_v24, %v761_v44 }
 0xcfb   :  { %v955_v32 = vadd.f32 1.0, %v2456_v30 }
 0xcfc   :  { %964 = vrot.lane.b32.xlu0 %v962_v25, %s2536_s22 }
 0xcfd   :  { %2457 = vrcp.f32 %v955_v32 }
 0xd07   :  { %v2458_v37 = vpop.eup %2457 }
 0xd4d   :  { %v1069_v26 = vpop.permute.xlu0 %1068 }
 0xd4e   :  { %v1071_v28 = vmul.f32 %v2446_v62, %v1069_v26 }
 0xd50   :  { %1073 = vrot.lane.b32.xlu1 %v1071_v28, %s2537_s3 }
 0xd6e   :  { %v965_v34 = vpop.permute.xlu0 %964 }
 0xd6f   :  { %v2917_v36 = vadd.f32 %v965_v34, %v961_v33 }
 0xd71   :  { %2459 = vtanh.f32 %v2917_v36 }
 0xd7b   :  { %v2460_v38 = vpop.eup %2459 }
 0xd7c   :  { %v2920_v41 = vmul.f32 %v2460_v38, %v2458_v37 }
 0xd7e   :  { %1076 = vrot.lane.b32.xlu0 %v2920_v41, %s2538_s5 }
 0xdc2   :  { %v1074_v42 = vpop.permute.xlu1 %1073 }
 0xdc3   :  { %2066 = vmatmul.mubr.msk.f32.vlgmr.msra.gmra.mrb[10].mxu1 %vm66_vm1, %v1074_v42 }
 0xdc4   :  { %2274 = vmatpush1.bf16.msra.mxu1 %v2669_v39  ;;  %1353 = vmatprep.mubr.f32.mxu1 %v2535_v8 }
 0xdc5   :  { %2276 = vmatprep.subr.bf16.mxu1 %v2671_v40 }
 0xdc8   :  { %2278 = vmatpush1.bf16.msra.mxu1 %v2688_v45 }
 0xdc9   :  { %2280 = vmatprep.subr.bf16.mxu1 %v2691_v46 }
 0xdcc   :  { %2282 = vmatpush1.bf16.msra.mxu1 %v2706_v51 }
 0xdcd   :  { %2284 = vmatprep.subr.bf16.mxu1 %v2709_v53 }
 0xdd0   :  { %2286 = vmatpush1.bf16.msra.mxu1 %v2725_v58 }
 0xdd1   :  { %2288 = vmatprep.subr.bf16.mxu1 %v2728_v59 }
 0xdd4   :  { %2290 = vmatpush1.bf16.msra.mxu1 %v2743_v1 }
 0xdd5   :  { %2292 = vmatprep.subr.bf16.mxu1 %v2746_v2 }
 0xdd8   :  { %2294 = vmatpush1.bf16.msra.mxu1 %v2755_v5 }
 0xdd9   :  { %2325 = vmatprep.subr.bf16.mxu1 %v2533_v0 }
 0xdf0   :  { %v1077_v43 = vpop.permute.xlu0 %1076 }
 0xdf1   :  { %v1079_v44 = vsel %vm66_vm1, %v1074_v42, %v1077_v43 }
 0xdf2   :  { %1917 = vmatmul.mubr.msk.f32.vlgmr.msra.gmra.mrb[10].mxu0 %vm254_vm2, %v1079_v44 }
 0xdf3   :  { %2297 = vmatpush3.bf16.msra.mxu0 %v2608_v9  ;;  %2076 = vmatprep.mubr.msk.f32.mxu0 %vm2534_vm0, %v2535_v8 }
 0xdf4   :  { %2298 = vmatprep.subr.bf16.mxu0 %v2533_v0 }
 0xdf7   :  { %2300 = vmatpush3.bf16.msra.mxu0 %v2618_v13 }
 0xdf8   :  { %2302 = vmatprep.subr.bf16.mxu0 %v2658_v35 }
 0xe96   :  { %v1249_v47 = vpop.f32.mrb[10].mxu1 }
 0xe97   :  { %v1253_v48 = vadd.f32 %v1249_v47, %v2637_v17  ;;  %v2067_v50 = vpop.f32.mrb[11].mxu1 }
 0xe99   :  { %2461 = vtanh.f32 %v1253_v48  ;;  %v1921_v4 = vmul.f32 -1.442695, %v1253_v48 }
 0xea3   :  { %v2462_v52 = vpop.eup %2461 }
 0xea4   :  { %1263 = vrot.lane.b32.xlu1 %v2462_v52, %s2536_s22 }
 0xec5   :  { %v1149_v54 = vpop.f32.mrb[10].mxu0 }
 0xec6   :  { %v1150_v55 = vadd.f32 %v1149_v54, %v2787_v18  ;;  %v1151_v31 = vpop.f32.mrb[11].mxu0 }
 0xec7   :  { %v1152_v57 = vadd.f32 %v1151_v31, %v2791_v27 }
 0xec8   :  { %v1918_v56 = vmul.f32 -1.442695, %v1150_v55 }
 0xec9   :  { %v1919_v14 = vmul.f32 -1.442695, %v1152_v57 }
 0xeca   :  { %2463 = vpow2.f32 %v1918_v56 }
 0xecb   :  { %2465 = vtanh.f32 %v1152_v57 }
 0xed4   :  { %v2464_v60 = vpop.eup %2463 }
 0xed5   :  { %v1160_v61 = vadd.f32 1.0, %v2464_v60  ;;  %v2466_v62 = vpop.eup %2465 }
 0xed7   :  { %2467 = vrcp.f32 %v1160_v61 }
 0xed8   :  { %2469 = vpow2.f32 %v1921_v4 }
 0xee1   :  { %v2468_v63 = vpop.eup %2467 }
 0xee2   :  { %v1168_v3 = vmul.f32 %v2468_v63, %v2466_v62  ;;  %v2470_v6 = vpop.eup %2469 }
 0xee3   :  { %v1257_v11 = vadd.f32 1.0, %v2470_v6 }
 0xee5   :  { %2471 = vrcp.f32 %v1257_v11 }
 0xeef   :  { %v2472_v12 = vpop.eup %2471 }
 0xef0   :  { %v1261_v19 = vmul.f32 %v2472_v12, %v2909_v7  ;;  %v1167_v7 = vmul.f32 %v2468_v63, %v2917_v36 }
 0xf16   :  { %v1264_v16 = vpop.permute.xlu1 %1263 }
 0xf17   :  { %v1266_v15 = vmul.f32 %v2472_v12, %v1264_v16 }
 0xf19   :  { %1268 = vrot.lane.b32.xlu1 %v1266_v15, %s2537_s3 }
 0xf8b   :  { %v1269_v21 = vpop.permute.xlu1 %1268 }
 0xf8c   :  { %v2952_v22 = vadd.f32 %v1269_v21, %v1261_v19 }
 0xf8e   :  { %2473 = vtanh.f32 %v2952_v22 }
 0xf8f   :  { %2475 = vpow2.f32 %v1919_v14 }
 0xf98   :  { %v2474_v23 = vpop.eup %2473 }
 0xf99   :  { %1274 = vrot.lane.b32.xlu0 %v2474_v23, %s2536_s22  ;;  %v2476_v24 = vpop.eup %2475 }
 0xf9a   :  { %v1161_v28 = vadd.f32 1.0, %v2476_v24 }
 0xf9c   :  { %2477 = vrcp.f32 %v1161_v28 }
 0xf9d   :  { %1170 = vrot.lane.b32.xlu0 %v1168_v3, %s2536_s22 }
 0xfa6   :  { %v2478_v32 = vpop.eup %2477 }
0x100b   :  { %v1275_v25 = vpop.permute.xlu0 %1274 }
0x100c   :  { %v1277_v26 = vmul.f32 %v2472_v12, %v1275_v25 }
0x100e   :  { %1279 = vrot.lane.b32.xlu1 %v1277_v26, %s2537_s3 }
0x100f   :  { %v1171_v29 = vpop.permute.xlu0 %1170 }
0x1010   :  { %v2959_v30 = vadd.f32 %v1171_v29, %v1167_v7 }
0x1012   :  { %2479 = vtanh.f32 %v2959_v30 }
0x101c   :  { %v2480_v33 = vpop.eup %2479 }
0x101d   :  { %v2962_v34 = vmul.f32 %v2480_v33, %v2478_v32 }
0x101f   :  { %1282 = vrot.lane.b32.xlu1 %v2962_v34, %s2538_s5 }
0x1080   :  { %v1280_v37 = vpop.permute.xlu1 %1279 }
0x1081   :  { %2077 = vmatmul.mubr.msk.f32.vlgmr.msra.gmra.mrb[12].mxu0 %vm66_vm1, %v1280_v37 }
0x1082   :  { %2304 = vmatpush1.bf16.msra.mxu0 %v2669_v39  ;;  %1559 = vmatprep.mubr.f32.mxu0 %v2535_v8 }
0x1083   :  { %2306 = vmatprep.subr.bf16.mxu0 %v2671_v40 }
0x1086   :  { %2308 = vmatpush1.bf16.msra.mxu0 %v2688_v45 }
0x1087   :  { %2310 = vmatprep.subr.bf16.mxu0 %v2691_v46 }
0x108a   :  { %2312 = vmatpush1.bf16.msra.mxu0 %v2706_v51 }
0x108b   :  { %2314 = vmatprep.subr.bf16.mxu0 %v2709_v53 }
0x108e   :  { %2316 = vmatpush1.bf16.msra.mxu0 %v2725_v58 }
0x108f   :  { %2318 = vmatprep.subr.bf16.mxu0 %v2728_v59 }
0x1091   :  { %v1283_v36 = vpop.permute.xlu1 %1282 }
0x1092   :  { %v1285_v38 = vsel %vm66_vm1, %v1280_v37, %v1283_v36  ;;  %2320 = vmatpush1.bf16.msra.mxu0 %v2743_v1 }
0x1093   :  { %1922 = vmatmul.mubr.msk.f32.vlgmr.msra.gmra.mrb[12].mxu1 %vm254_vm2, %v1285_v38  ;;  %2322 = vmatprep.subr.bf16.mxu0 %v2746_v2 }
0x1094   :  { %2327 = vmatpush3.bf16.msra.mxu1 %v2608_v9  ;;  %2087 = vmatprep.mubr.msk.f32.mxu1 %vm2534_vm0, %v2535_v8 }
0x1095   :  { %2328 = vmatprep.subr.bf16.mxu1 %v2533_v0 }
0x1096   :  { %2324 = vmatpush1.bf16.msra.mxu0 %v2755_v5 }
0x1097   :  { %2355 = vmatprep.subr.bf16.mxu0 %v2533_v0 }
0x1098   :  { %2330 = vmatpush3.bf16.msra.mxu1 %v2618_v13 }
0x1099   :  { %2332 = vmatprep.subr.bf16.mxu1 %v2658_v35 }
0x1154   :  { %v1455_v42 = vpop.f32.mrb[12].mxu0 }
0x1155   :  { %v1459_v43 = vadd.f32 %v1455_v42, %v2637_v17  ;;  %v2078_v44 = vpop.f32.mrb[13].mxu0 }
0x1157   :  { %2481 = vtanh.f32 %v1459_v43  ;;  %v1926_v57 = vmul.f32 -1.442695, %v1459_v43 }
0x1161   :  { %v2482_v47 = vpop.eup %2481 }
0x1162   :  { %1469 = vrot.lane.b32.xlu0 %v2482_v47, %s2536_s22 }
0x1166   :  { %v1355_v9 = vpop.f32.mrb[12].mxu1 }
0x1167   :  { %v1356_v48 = vadd.f32 %v1355_v9, %v2787_v18  ;;  %v1357_v50 = vpop.f32.mrb[13].mxu1 }
0x1168   :  { %v1358_v54 = vadd.f32 %v1357_v50, %v2791_v27 }
0x1169   :  { %v1923_v52 = vmul.f32 -1.442695, %v1356_v48 }
0x116a   :  { %v1924_v16 = vmul.f32 -1.442695, %v1358_v54 }
0x116b   :  { %2483 = vpow2.f32 %v1923_v52 }
0x116c   :  { %2485 = vtanh.f32 %v1358_v54 }
0x1175   :  { %v2484_v55 = vpop.eup %2483 }
0x1176   :  { %v1366_v13 = vadd.f32 1.0, %v2484_v55  ;;  %v2486_v35 = vpop.eup %2485 }
0x1178   :  { %2487 = vrcp.f32 %v1366_v13 }
0x1179   :  { %2489 = vpow2.f32 %v1926_v57 }
0x1182   :  { %v2488_v31 = vpop.eup %2487 }
0x1183   :  { %v1374_v56 = vmul.f32 %v2488_v31, %v2486_v35  ;;  %v2490_v60 = vpop.eup %2489 }
0x1184   :  { %v1463_v61 = vadd.f32 1.0, %v2490_v60 }
0x1186   :  { %2491 = vrcp.f32 %v1463_v61 }
0x1190   :  { %v2492_v62 = vpop.eup %2491 }
0x1191   :  { %v1467_v4 = vmul.f32 %v2492_v62, %v2952_v22  ;;  %v1373_v22 = vmul.f32 %v2488_v31, %v2959_v30 }
0x11d4   :  { %v1470_v63 = vpop.permute.xlu0 %1469 }
0x11d5   :  { %v1472_v3 = vmul.f32 %v2492_v62, %v1470_v63 }
0x11d7   :  { %1474 = vrot.lane.b32.xlu1 %v1472_v3, %s2537_s3 }
0x1249   :  { %v1475_v6 = vpop.permute.xlu1 %1474 }
0x124a   :  { %v2994_v11 = vadd.f32 %v1475_v6, %v1467_v4 }
0x124c   :  { %2493 = vtanh.f32 %v2994_v11 }
0x124d   :  { %2495 = vpow2.f32 %v1924_v16 }
0x1256   :  { %v2494_v12 = vpop.eup %2493 }
0x1257   :  { %1480 = vrot.lane.b32.xlu0 %v2494_v12, %s2536_s22  ;;  %v2496_v15 = vpop.eup %2495 }
0x1258   :  { %v1367_v23 = vadd.f32 1.0, %v2496_v15 }
0x125a   :  { %2497 = vrcp.f32 %v1367_v23 }
0x125b   :  { %1376 = vrot.lane.b32.xlu0 %v1374_v56, %s2536_s22 }
0x1264   :  { %v2498_v25 = vpop.eup %2497 }
0x12c9   :  { %v1481_v19 = vpop.permute.xlu0 %1480 }
0x12ca   :  { %v1483_v21 = vmul.f32 %v2492_v62, %v1481_v19 }
0x12cc   :  { %1485 = vrot.lane.b32.xlu1 %v1483_v21, %s2537_s3 }
0x12cd   :  { %v1377_v14 = vpop.permute.xlu0 %1376 }
0x12ce   :  { %v1379_v24 = vadd.f32 %v1377_v14, %v1373_v22 }
0x12d0   :  { %2499 = vtanh.f32 %v1379_v24 }
0x12da   :  { %v2500_v26 = vpop.eup %2499 }
0x12db   :  { %v3001_v28 = vmul.f32 %v2500_v26, %v2498_v25  ;;  %v1803_v26 = vld [vmem:[%s3102_s6 + $0x18] sm:$0xff] }
0x12dd   :  { %1488 = vrot.lane.b32.xlu1 %v3001_v28, %s2538_s5 }
0x133e   :  { %v1486_v7 = vpop.permute.xlu1 %1485 }
0x133f   :  { %2088 = vmatmul.mubr.msk.f32.vlgmr.msra.gmra.mrb[14].mxu1 %vm66_vm1, %v1486_v7 }
0x1340   :  { %2334 = vmatpush1.bf16.msra.mxu1 %v2669_v39  ;;  %1765 = vmatprep.mubr.f32.mxu1 %v2535_v8 }
0x1341   :  { %2336 = vmatprep.subr.bf16.mxu1 %v2671_v40 }
0x1344   :  { %2338 = vmatpush1.bf16.msra.mxu1 %v2688_v45 }
0x1345   :  { %2340 = vmatprep.subr.bf16.mxu1 %v2691_v46 }
0x1348   :  { %2342 = vmatpush1.bf16.msra.mxu1 %v2706_v51 }
0x1349   :  { %2344 = vmatprep.subr.bf16.mxu1 %v2709_v53 }
0x134c   :  { %2346 = vmatpush1.bf16.msra.mxu1 %v2725_v58 }
0x134d   :  { %2348 = vmatprep.subr.bf16.mxu1 %v2728_v59 }
0x134f   :  { %v1489_v29 = vpop.permute.xlu1 %1488 }
0x1350   :  { %v1491_v30 = vsel %vm66_vm1, %v1486_v7, %v1489_v29  ;;  %2350 = vmatpush1.bf16.msra.mxu1 %v2743_v1 }
0x1351   :  { %1927 = vmatmul.mubr.msk.f32.vlgmr.msra.gmra.mrb[14].mxu0 %vm254_vm2, %v1491_v30  ;;  %2352 = vmatprep.subr.bf16.mxu1 %v2746_v2 }
0x1352   :  { %2106 = vmatprep.mubr.msk.f32.mxu0 %vm2534_vm0, %v2535_v8 }
0x1354   :  { %2354 = vmatpush1.bf16.msra.mxu1 %v2755_v5 }
0x1412   :  { %v1661_v39 = vpop.f32.mrb[14].mxu1 }
0x1413   :  { %v1665_v40 = vadd.f32 %v1661_v39, %v2637_v17  ;;  %v2089_v45 = vpop.f32.mrb[15].mxu1 }
0x1415   :  { %2501 = vtanh.f32 %v1665_v40  ;;  %v1931_v33 = vmul.f32 -1.442695, %v1665_v40 }
0x141f   :  { %v2502_v46 = vpop.eup %2501 }
0x1420   :  { %1675 = vrot.lane.b32.xlu0 %v2502_v46, %s2536_s22  ;;  %v1805_v46 = vld [vmem:[%s3102_s6 + $0x28] sm:$0xff] }
0x1424   :  { %v1561_v51 = vpop.f32.mrb[14].mxu0 }
0x1425   :  { %v1562_v53 = vadd.f32 %v1561_v51, %v2787_v18  ;;  %v1563_v58 = vpop.f32.mrb[15].mxu0 }
0x1426   :  { %v1564_v1 = vadd.f32 %v1563_v58, %v2791_v27  ;;  %v1807_v58 = vld [vmem:[%s3102_s6 + $0x38] sm:$0xff] }
0x1427   :  { %v1928_v59 = vmul.f32 -1.442695, %v1562_v53 }
0x1428   :  { %v1929_v44 = vmul.f32 -1.442695, %v1564_v1 }
0x1429   :  { %2503 = vpow2.f32 %v1928_v59 }
0x142a   :  { %2505 = vtanh.f32 %v1564_v1 }
0x1433   :  { %v2504_v2 = vpop.eup %2503 }
0x1434   :  { %v1572_v8 = vadd.f32 1.0, %v2504_v2  ;;  %v2506_v5 = vpop.eup %2505 }
0x1436   :  { %2507 = vrcp.f32 %v1572_v8 }
0x1437   :  { %2509 = vpow2.f32 %v1931_v33 }
0x1440   :  { %v2508_v32 = vpop.eup %2507 }
0x1441   :  { %v1580_v17 = vmul.f32 %v2508_v32, %v2506_v5  ;;  %v2510_v37 = vpop.eup %2509  ;;  %v1579_v9 = vmul.f32 %v2508_v32, %v1379_v24  ;;  %v1800_v24 = vld [vmem:[%s3102_s6] sm:$0xff]  ;;  %v13_v5 = vstv %s3103_s7 }
0x1442   :  { %v1669_v36 = vadd.f32 1.0, %v2510_v37  ;;  %14 = vst [vmem:[#allocation3] sm:$0x1] %v13_v5 }
0x1443   :  { %1582 = vrot.lane.b32.xlu0 %v1580_v17, %s2536_s22 }
0x1444   :  { %2511 = vrcp.f32 %v1669_v36 }
0x1445   :  { %2513 = vpow2.f32 %v1929_v44 }
0x1449   :  { %v1935_v37 = vld [vmem:[#allocation3] ss:$0 sm:$0xff] }
0x144e   :  { %v2512_v38 = vpop.eup %2511 }
0x144f   :  { %v2514_v48 = vpop.eup %2513  ;;  %v1673_v52 = vmul.f32 %v2512_v38, %v2994_v11 }
0x1450   :  { %v1573_v55 = vadd.f32 1.0, %v2514_v48 }
0x1492   :  { %v1676_v42 = vpop.permute.xlu0 %1675 }
0x1493   :  { %v1678_v43 = vmul.f32 %v2512_v38, %v1676_v42 }
0x1495   :  { %1680 = vrot.lane.b32.xlu1 %v1678_v43, %s2537_s3 }
0x14b5   :  { %v1583_v47 = vpop.permute.xlu0 %1582 }
0x14b6   :  { %v3028_v50 = vadd.f32 %v1583_v47, %v1579_v9 }
0x14b8   :  { %2515 = vtanh.f32 %v3028_v50 }
0x14c2   :  { %v2516_v35 = vpop.eup %2515 }
0x1507   :  { %v1681_v54 = vpop.permute.xlu1 %1680 }
0x1508   :  { %v1683_v13 = vadd.f32 %v1681_v54, %v1673_v52 }
0x150a   :  { %2517 = vtanh.f32 %v1683_v13 }
0x150b   :  { %2519 = vrcp.f32 %v1573_v55 }
0x1514   :  { %v2518_v31 = vpop.eup %2517 }
0x1515   :  { %1686 = vrot.lane.b32.xlu1 %v2518_v31, %s2536_s22  ;;  %v2520_v56 = vpop.eup %2519 }
0x1516   :  { %v1587_v57 = vmul.f32 %v2520_v56, %v2516_v35 }
0x1519   :  { %1694 = vrot.lane.b32.xlu1 %v1587_v57, %s2538_s5 }
0x151d   :  { %352 = vrot.lane.b32.xlu1 %v2820_v20, %s2536_s22 }
0x1521   :  { %765 = vrot.lane.b32.xlu1 %v2893_v49, %s2536_s22 }
0x1525   :  { %1177 = vrot.lane.b32.xlu1 %v2962_v34, %s2536_s22 }
0x1529   :  { %1589 = vrot.lane.b32.xlu1 %v1587_v57, %s2536_s22 }
0x1587   :  { %v1687_v60 = vpop.permute.xlu1 %1686 }
0x1588   :  { %v1689_v61 = vmul.f32 %v2512_v38, %v1687_v60 }
0x158a   :  { %1691 = vrot.lane.b32.xlu0 %v1689_v61, %s2537_s3 }
0x158b   :  { %v1695_v62 = vpop.permute.xlu1 %1694 }
0x158f   :  { %v353_v63 = vpop.permute.xlu1 %352 }
0x1590   :  { %356 = vst.msk [vmem:[#allocation2] sm:$0x1] %vm355_vm3, %v353_v63 }
0x1593   :  { %v766_v3 = vpop.permute.xlu1 %765 }
0x1594   :  { %768 = vst.msk [vmem:[#allocation2 + $0x2] sm:$0x1] %vm355_vm3, %v766_v3 }
0x1597   :  { %v1178_v20 = vpop.permute.xlu1 %1177 }
0x1598   :  { %1180 = vst.msk [vmem:[#allocation2 + $0x4] sm:$0x1] %vm355_vm3, %v1178_v20 }
0x159b   :  { %v1590_v49 = vpop.permute.xlu1 %1589 }
0x159c   :  { %1592 = vst.msk [vmem:[#allocation2 + $0x6] sm:$0x1] %vm355_vm3, %v1590_v49 }
0x15fc   :  { %v1692_v34 = vpop.permute.xlu0 %1691 }
0x15fd   :  { %v1697_v4 = vsel %vm66_vm1, %v1692_v34, %v1695_v62 }
0x15fe   :  { %1932 = vmatmul.mubr.msk.f32.vlgmr.msra.gmra.mrb[16].mxu1 %vm254_vm2, %v1697_v4 }
0x16d1   :  { %v1767_v6 = vpop.f32.mrb[16].mxu1 }
0x16d2   :  { %v1768_v11 = vadd.f32 %v1767_v6, %v2787_v18  ;;  %v1769_v12 = vpop.f32.mrb[17].mxu1  ;;  %v1801_v18 = vld [vmem:[%s3102_s6 + $0x8] sm:$0xff] }
0x16d3   :  { %v1770_v15 = vadd.f32 %v1769_v12, %v2791_v27  ;;  %v1802_v27 = vld [vmem:[%s3102_s6 + $0x10] sm:$0xff]  ;;  %v2356_v25 = vpack.c.bf16 %v1801_v18, %v1800_v24 }
0x16d4   :  { %v1933_v16 = vmul.f32 -1.442695, %v1768_v11  ;;  %v2359_v7 = vpack.c.bf16 %v1803_v26, %v1802_v27 }
0x16d5   :  { %2357 = vmatpush3.bf16.msra.mxu0 %v2356_v25  ;;  %v1934_v29 = vmul.f32 -1.442695, %v1770_v15 }
0x16d6   :  { %2521 = vpow2.f32 %v1933_v16  ;;  %2358 = vmatprep.subr.bf16.mxu0 %v2533_v0 }
0x16d7   :  { %2523 = vtanh.f32 %v1770_v15 }
0x16d9   :  { %2360 = vmatpush3.bf16.msra.mxu0 %v2359_v7 }
0x16da   :  { %2361 = vmatprep.subr.bf16.mxu0 %v2533_v0 }
0x16e0   :  { %v2522_v19 = vpop.eup %2521 }
0x16e1   :  { %v1778_v21 = vadd.f32 1.0, %v2522_v19  ;;  %v2524_v23 = vpop.eup %2523 }
0x16e3   :  { %2525 = vrcp.f32 %v1778_v21 }
0x16e4   :  { %2527 = vpow2.f32 %v1934_v29 }
0x16ed   :  { %v2526_v22 = vpop.eup %2525 }
0x16ee   :  { %v1786_v14 = vmul.f32 %v2526_v22, %v2524_v23  ;;  %v1785_v39 = vmul.f32 %v2526_v22, %v3028_v50 }
0x16f0   :  { %1788 = vrot.lane.b32.xlu0 %v1786_v14, %s2536_s22 }
0x16f4   :  { %559 = vrot.lane.b32.xlu0 %v2858_v10, %s2536_s22  ;;  %v2528_v10 = vpop.eup %2527 }
0x16f5   :  { %v1779_v30 = vadd.f32 1.0, %v2528_v10 }
0x16f7   :  { %2529 = vrcp.f32 %v1779_v30 }
0x16f8   :  { %971 = vrot.lane.b32.xlu0 %v2920_v41, %s2536_s22  ;;  %v1804_v41 = vld [vmem:[%s3102_s6 + $0x20] sm:$0xff] }
0x16f9   :  { %v2362_v53 = vpack.c.bf16 %v1805_v46, %v1804_v41 }
0x16fb   :  { %2363 = vmatpush3.bf16.msra.mxu0 %v2362_v53 }
0x16fc   :  { %1383 = vrot.lane.b32.xlu0 %v3001_v28, %s2536_s22  ;;  %v1806_v28 = vld [vmem:[%s3102_s6 + $0x30] sm:$0xff]  ;;  %2364 = vmatprep.subr.bf16.mxu0 %v2533_v0 }
0x16fd   :  { %v2365_v59 = vpack.c.bf16 %v1807_v58, %v1806_v28 }
0x16ff   :  { %2366 = vmatpush3.bf16.msra.mxu0 %v2365_v59 }
0x1701   :  { %v2530_v2 = vpop.eup %2529 }
0x1762   :  { %v1789_v40 = vpop.permute.xlu0 %1788 }
0x1763   :  { %v1791_v45 = vadd.f32 %v1789_v40, %v1785_v39 }
0x1765   :  { %2531 = vtanh.f32 %v1791_v45 }
0x1766   :  { %v560_v51 = vpop.permute.xlu0 %559 }
0x1767   :  { %562 = vst.msk [vmem:[#allocation2 + $0x1] sm:$0x1] %vm355_vm3, %v560_v51 }
0x176a   :  { %v972_v1 = vpop.permute.xlu0 %971 }
0x176b   :  { %974 = vst.msk [vmem:[#allocation2 + $0x3] sm:$0x1] %vm355_vm3, %v972_v1 }
0x176e   :  { %v1384_v8 = vpop.permute.xlu0 %1383 }
0x176f   :  { %v2532_v32 = vpop.eup %2531  ;;  %1386 = vst.msk [vmem:[#allocation2 + $0x5] sm:$0x1] %vm355_vm3, %v1384_v8 }
0x1770   :  { %v1793_v17 = vmul.f32 %v2532_v32, %v2530_v2 }
0x1772   :  { %1795 = vrot.lane.b32.xlu0 %v1793_v17, %s2536_s22 }
0x17e4   :  { %v1796_v33 = vpop.permute.xlu0 %1795 }
0x17e5   :  { %1798 = vst.msk [vmem:[#allocation2 + $0x7] sm:$0x1] %vm355_vm3, %v1796_v33 }
0x17ec   :  { %v1799_v0 = vld [vmem:[#allocation2] sm:$0xff] }
0x17ed   :  { %2107 = vmatmul.mubr.msk.f32.vlgmr.msra.gmra.mrb[16].mxu0 %vm1815_vm4, %v1799_v0 }
0x18c0   :  { %v1885_v36 = vpop.f32.mrb[16].mxu0 }
0x18c1   :  { %v1886_v38 = vadd.f32 %v1935_v37, %v1885_v36  ;;  %v2108_v42 = vpop.f32.mrb[17].mxu0 }
0x18c3   :  { %1890 = vst.msk [vmem:[%s3104_s8] sm:$0xff] %vm1889_vm5, %v1886_v38 }

</bundles_post_ra>
